<compile_context>
chip_gen: v7x
topology: tpu7x:2x2x1
jax: 0.10.0
libtpu: 0.0.40
codegen_flags: <defaults>
</compile_context>

<pallas_src>
from functools import partial

import jax
import jax.numpy as jnp
from jax.experimental import pallas as pl
from jax.experimental.pallas import tpu as pltpu


def transformer_layer_kernel(x_ref, wqkv_ref, bqkv_ref, wo_ref, bo_ref,
                             w1_ref, b1_ref, w2_ref, b2_ref,
                             g1_ref, beta1_ref, g2_ref, beta2_ref,
                             o_ref, attn_scratch,
                             *, num_heads, seq_len, seqs_per_tile, approx_recip):
    """One row tile of `seqs_per_tile` complete sequences: rows are batch-major (b*S + s)."""
    E = x_ref.shape[-1]
    S, H = seq_len, num_heads
    hd = E // H
    scale = float(hd) ** -0.5

    x = x_ref[...]                                              # (TM, E) f32
    xb = x.astype(jnp.bfloat16)

    # ---- fused QKV projection: bf16 MXU operands, f32 accumulation ----
    qkv = jnp.dot(xb, wqkv_ref[...],
                  preferred_element_type=jnp.float32) + bqkv_ref[...]   # (TM, 3E) f32
    qkv_b = qkv.astype(jnp.bfloat16)                             # MXU operand copy

    # ---- attention: per-(sequence, head) dots on static slices, results written
    #      directly into the (TM, E) VMEM scratch slab (no stack/concat relayouts) ----
    for sb in range(seqs_per_tile):
        r0 = sb * S
        for h in range(H):
            c0 = h * hd
            q = qkv_b[r0:r0 + S, 0 * E + c0: 0 * E + c0 + hd]    # (S, hd) bf16
            k = qkv_b[r0:r0 + S, 1 * E + c0: 1 * E + c0 + hd]
            v = qkv_b[r0:r0 + S, 2 * E + c0: 2 * E + c0 + hd]

            # q @ k^T via dot_general (contract last dims; no explicit transpose)
            s = jax.lax.dot_general(q, k, (((1,), (1,)), ((), ())),
                                    preferred_element_type=jnp.float32) * scale  # (S, S) f32
            m = jnp.max(s, axis=-1, keepdims=True)
            p = jnp.exp(s - m)                                   # f32 (EUP)
            l = jnp.sum(p, axis=-1, keepdims=True)               # (S, 1)
            o = jnp.dot(p.astype(jnp.bfloat16), v,
                        preferred_element_type=jnp.float32)      # (S, hd) f32
            # deferred softmax normalization: scales S*hd, not S*S
            o = o * pl.reciprocal(l, approx=approx_recip)
            attn_scratch[r0:r0 + S, c0:c0 + hd] = o.astype(jnp.bfloat16)

    # ---- output projection over the whole tile ----
    attn = jnp.dot(attn_scratch[...], wo_ref[...],
                   preferred_element_type=jnp.float32) + bo_ref[...]     # (TM, E) f32

    # ---- residual + LayerNorm1 (dropout = identity in eval; f32 math) ----
    x1 = x + attn
    mu1 = jnp.mean(x1, axis=-1, keepdims=True)
    var1 = jnp.mean((x1 - mu1) ** 2, axis=-1, keepdims=True)
    x1 = (x1 - mu1) * jax.lax.rsqrt(var1 + 1e-5) * g1_ref[...] + beta1_ref[...]

    # ---- feed-forward: Linear -> ReLU -> Linear (bf16 MXU operands, f32 accum) ----
    h1 = jnp.dot(x1.astype(jnp.bfloat16), w1_ref[...],
                 preferred_element_type=jnp.float32) + b1_ref[...]
    h1 = jnp.maximum(h1, 0.0)
    ff = jnp.dot(h1.astype(jnp.bfloat16), w2_ref[...],
                 preferred_element_type=jnp.float32) + b2_ref[...]

    # ---- residual + LayerNorm2 ----
    x2 = x1 + ff
    mu2 = jnp.mean(x2, axis=-1, keepdims=True)
    var2 = jnp.mean((x2 - mu2) ** 2, axis=-1, keepdims=True)
    o_ref[...] = ((x2 - mu2) * jax.lax.rsqrt(var2 + 1e-5)
                  * g2_ref[...] + beta2_ref[...]).astype(o_ref.dtype)


def transformer_layer(x_sbe, params, num_heads, *, seqs_per_tile=None, approx_recip=True):
    """x_sbe: (S, B, E) float32 (PyTorch seq/batch/embed convention). Params in PyTorch layout."""
    S, B, E = x_sbe.shape
    FF = params["ff_w1"].shape[0]
    assert E % num_heads == 0, "embed_dim must be divisible by num_heads"

    # pick a row tile that holds whole sequences (~256 rows, bounded by B)
    if seqs_per_tile is None:
        seqs_per_tile = max(1, min(B, 256 // max(S, 1)))
        while B % seqs_per_tile:
            seqs_per_tile -= 1
    assert B % seqs_per_tile == 0
    TM = seqs_per_tile * S
    num_tiles = B // seqs_per_tile

    # one-time layout prep OUTSIDE the kernel: batch-major row fold + pre-transposed,
    # bf16-cast weights (biases / LN params stay f32).
    x2d = jnp.transpose(x_sbe, (1, 0, 2)).reshape(B * S, E)      # (B*S, E) f32
    bf = jnp.bfloat16
    wqkv = params["in_w"].T.astype(bf)                           # (E, 3E)
    bqkv = params["in_b"].reshape(1, 3 * E).astype(jnp.float32)
    wo = params["out_w"].T.astype(bf)                            # (E, E)
    bo = params["out_b"].reshape(1, E).astype(jnp.float32)
    w1 = params["ff_w1"].T.astype(bf)                            # (E, FF)
    b1 = params["ff_b1"].reshape(1, FF).astype(jnp.float32)
    w2 = params["ff_w2"].T.astype(bf)                            # (FF, E)
    b2 = params["ff_b2"].reshape(1, E).astype(jnp.float32)
    g1 = params["g1"].reshape(1, E).astype(jnp.float32)
    be1 = params["beta1"].reshape(1, E).astype(jnp.float32)
    g2 = params["g2"].reshape(1, E).astype(jnp.float32)
    be2 = params["beta2"].reshape(1, E).astype(jnp.float32)

    weights = [wqkv, bqkv, wo, bo, w1, b1, w2, b2, g1, be1, g2, be2]

    kernel = partial(transformer_layer_kernel, num_heads=num_heads, seq_len=S,
                     seqs_per_tile=seqs_per_tile, approx_recip=approx_recip)

    row_spec = pl.BlockSpec((TM, E), lambda i: (i, 0))
    # constant block index -> each weight is DMA'd once and stays VMEM-resident
    weight_specs = [pl.BlockSpec(w.shape, lambda i: (0, 0)) for w in weights]

    out2d = pl.pallas_call(
        kernel,
        out_shape=jax.ShapeDtypeStruct((B * S, E), jnp.float32),
        grid=(num_tiles,),
        in_specs=[row_spec] + weight_specs,
        out_specs=row_spec,
        scratch_shapes=[pltpu.VMEM((TM, E), jnp.bfloat16)],      # per-head attention slab
        compiler_params=pltpu.CompilerParams(
            dimension_semantics=("parallel",),
            vmem_limit_bytes=32 * 1024 * 1024),
    )(x2d, *weights)

    return jnp.transpose(out2d.reshape(B, S, E), (1, 0, 2))      # back to (S, B, E)


# ----------------------- pure-JAX f32 reference (for self-check) -----------------------
def _layer_norm(x, g, b, eps=1e-5):
    mu = jnp.mean(x, axis=-1, keepdims=True)
    var = jnp.mean((x - mu) ** 2, axis=-1, keepdims=True)
    return (x - mu) * jax.lax.rsqrt(var + eps) * g + b


def reference_forward(x_sbe, params, num_heads):
    S, B, E = x_sbe.shape
    hd = E // num_heads
    x = jnp.transpose(x_sbe, (1, 0, 2))                          # (B, S, E)
    qkv = x @ params["in_w"].T + params["in_b"]
    q, k, v = qkv[..., :E], qkv[..., E:2 * E], qkv[..., 2 * E:]

    def split(t):
        return jnp.transpose(t.reshape(B, S, num_heads, hd), (0, 2, 1, 3))

    q, k, v = split(q), split(k), split(v)
    s = jnp.einsum('bhqd,bhkd->bhqk', q, k) / jnp.sqrt(jnp.float32(hd))
    p = jax.nn.softmax(s, axis=-1)
    o = jnp.einsum('bhqk,bhkd->bhqd', p, v)
    o = jnp.transpose(o, (0, 2, 1, 3)).reshape(B, S, E)
    attn = o @ params["out_w"].T + params["out_b"]
    x1 = _layer_norm(x + attn, params["g1"], params["beta1"])
    h = jax.nn.relu(x1 @ params["ff_w1"].T + params["ff_b1"])
    ff = h @ params["ff_w2"].T + params["ff_b2"]
    x2 = _layer_norm(x1 + ff, params["g2"], params["beta2"])
    return jnp.transpose(x2, (1, 0, 2))


if __name__ == "__main__":
    # small but lane-dense shapes: embed=256, heads=2 (head_dim=128), ff=512, seq=16, batch=4
    E, H, FF = 256, 2, 512
    S, B = 16, 4

    key = jax.random.PRNGKey(0)
    ks = jax.random.split(key, 9)
    # params stored in PyTorch layout (Linear weight = (out_features, in_features))
    params = dict(
        in_w=jax.random.normal(ks[0], (3 * E, E), jnp.float32) * 0.05,
        in_b=jax.random.normal(ks[1], (3 * E,), jnp.float32) * 0.01,
        out_w=jax.random.normal(ks[2], (E, E), jnp.float32) * 0.05,
        out_b=jax.random.normal(ks[3], (E,), jnp.float32) * 0.01,
        ff_w1=jax.random.normal(ks[4], (FF, E), jnp.float32) * 0.05,
        ff_b1=jax.random.normal(ks[5], (FF,), jnp.float32) * 0.01,
        ff_w2=jax.random.normal(ks[6], (E, FF), jnp.float32) * 0.05,
        ff_b2=jax.random.normal(ks[7], (E,), jnp.float32) * 0.01,
        g1=jnp.ones((E,), jnp.float32), beta1=jnp.zeros((E,), jnp.float32),
        g2=jnp.ones((E,), jnp.float32), beta2=jnp.zeros((E,), jnp.float32),
    )

    x = jax.random.normal(ks[8], (S, B, E), jnp.float32)         # (seq, batch, embed)
    # seqs_per_tile=2 -> 2-step row-tile grid (exercises pipelining + resident weights)
    y = transformer_layer(x, params, H, seqs_per_tile=2)
    jax.block_until_ready(y)
    assert y.shape == (S, B, E) and y.dtype == jnp.float32

    y_ref = reference_forward(x, params, H)
    max_err = float(jnp.max(jnp.abs(y - y_ref)))
    # bf16 MXU operands + approx reciprocal -> compare against f32 reference at loose tol
    assert jnp.allclose(y, y_ref, atol=5e-2, rtol=5e-2), f"max abs err = {max_err}"
    print("KERNEL_OK")
</pallas_src>

<mosaic_0001>
module attributes {stable_mosaic.version = 11 : i64} {
  func.func @transformer_layer_kernel(%arg0: i32, %arg1: memref<32x256xf32, #tpu.memory_space<vmem>>, %arg2: memref<256x768xbf16, #tpu.memory_space<vmem>>, %arg3: memref<1x768xf32, #tpu.memory_space<vmem>>, %arg4: memref<256x256xbf16, #tpu.memory_space<vmem>>, %arg5: memref<1x256xf32, #tpu.memory_space<vmem>>, %arg6: memref<256x512xbf16, #tpu.memory_space<vmem>>, %arg7: memref<1x512xf32, #tpu.memory_space<vmem>>, %arg8: memref<512x256xbf16, #tpu.memory_space<vmem>>, %arg9: memref<1x256xf32, #tpu.memory_space<vmem>>, %arg10: memref<1x256xf32, #tpu.memory_space<vmem>>, %arg11: memref<1x256xf32, #tpu.memory_space<vmem>>, %arg12: memref<1x256xf32, #tpu.memory_space<vmem>>, %arg13: memref<1x256xf32, #tpu.memory_space<vmem>>, %arg14: memref<32x256xf32, #tpu.memory_space<vmem>>, %arg15: memref<32x256xbf16, #tpu.memory_space<vmem>>) attributes {dimension_semantics = [#tpu.dimension_semantics<parallel>], iteration_bounds = array<i64: 2>, scalar_prefetch = 0 : i64, scratch_operands = 1 : i64, tpu.core_type = #tpu.core_type<tc>, window_params = [{transform_indices = @transform_0, window_bounds = array<i64: 32, 256>}, {pipeline_mode = #tpu.pipeline_mode<synchronous>, transform_indices = @transform_1, window_bounds = array<i64: 256, 768>}, {pipeline_mode = #tpu.pipeline_mode<synchronous>, transform_indices = @transform_2, window_bounds = array<i64: 1, 768>}, {pipeline_mode = #tpu.pipeline_mode<synchronous>, transform_indices = @transform_3, window_bounds = array<i64: 256, 256>}, {pipeline_mode = #tpu.pipeline_mode<synchronous>, transform_indices = @transform_4, window_bounds = array<i64: 1, 256>}, {pipeline_mode = #tpu.pipeline_mode<synchronous>, transform_indices = @transform_5, window_bounds = array<i64: 256, 512>}, {pipeline_mode = #tpu.pipeline_mode<synchronous>, transform_indices = @transform_6, window_bounds = array<i64: 1, 512>}, {pipeline_mode = #tpu.pipeline_mode<synchronous>, transform_indices = @transform_7, window_bounds = array<i64: 512, 256>}, {pipeline_mode = #tpu.pipeline_mode<synchronous>, transform_indices = @transform_8, window_bounds = array<i64: 1, 256>}, {pipeline_mode = #tpu.pipeline_mode<synchronous>, transform_indices = @transform_9, window_bounds = array<i64: 1, 256>}, {pipeline_mode = #tpu.pipeline_mode<synchronous>, transform_indices = @transform_10, window_bounds = array<i64: 1, 256>}, {pipeline_mode = #tpu.pipeline_mode<synchronous>, transform_indices = @transform_11, window_bounds = array<i64: 1, 256>}, {pipeline_mode = #tpu.pipeline_mode<synchronous>, transform_indices = @transform_12, window_bounds = array<i64: 1, 256>}, {transform_indices = @transform_13, window_bounds = array<i64: 32, 256>}]} {
    %c0 = arith.constant 0 : index
    %c0_0 = arith.constant 0 : index
    %0 = vector.load %arg1[%c0, %c0_0] : memref<32x256xf32, #tpu.memory_space<vmem>>, vector<32x256xf32>
    %1 = arith.truncf %0 : vector<32x256xf32> to vector<32x256xbf16>
    %c0_1 = arith.constant 0 : index
    %c0_2 = arith.constant 0 : index
    %2 = vector.load %arg2[%c0_1, %c0_2] : memref<256x768xbf16, #tpu.memory_space<vmem>>, vector<256x768xbf16>
    %cst = arith.constant dense<0.000000e+00> : vector<32x768xf32>
    %3 = tpu.matmul %1, %2, %cst {dimension_numbers = #tpu.dot_dimension_numbers<[1], [0], [0], [1], [0, 0, 1, 1], [], []>} : vector<32x256xbf16>, vector<256x768xbf16>, vector<32x768xf32> -> vector<32x768xf32>
    %c0_3 = arith.constant 0 : index
    %c0_4 = arith.constant 0 : index
    %4 = vector.load %arg3[%c0_3, %c0_4] : memref<1x768xf32, #tpu.memory_space<vmem>>, vector<1x768xf32>
    %5 = vector.broadcast %4 : vector<1x768xf32> to vector<32x768xf32>
    %6 = arith.addf %3, %5 : vector<32x768xf32>
    %7 = arith.truncf %6 : vector<32x768xf32> to vector<32x768xbf16>
    %8 = vector.extract_strided_slice %7 {offsets = [0, 0], sizes = [16, 128], strides = [1, 1]} : vector<32x768xbf16> to vector<16x128xbf16>
    %9 = vector.extract_strided_slice %7 {offsets = [0, 256], sizes = [16, 128], strides = [1, 1]} : vector<32x768xbf16> to vector<16x128xbf16>
    %10 = vector.extract_strided_slice %7 {offsets = [0, 512], sizes = [16, 128], strides = [1, 1]} : vector<32x768xbf16> to vector<16x128xbf16>
    %cst_5 = arith.constant dense<0.000000e+00> : vector<16x16xf32>
    %11 = tpu.matmul %8, %9, %cst_5 {dimension_numbers = #tpu.dot_dimension_numbers<[1], [1], [0], [0], [0, 0, 1, 0], [], []>} : vector<16x128xbf16>, vector<16x128xbf16>, vector<16x16xf32> -> vector<16x16xf32>
    %cst_6 = arith.constant 0.0883883461 : f32
    %12 = vector.broadcast %cst_6 : f32 to vector<16x16xf32>
    %13 = arith.mulf %11, %12 : vector<16x16xf32>
    %cst_7 = arith.constant dense<0xFF800000> : vector<16xf32>
    %14 = vector.multi_reduction <maximumf>, %13, %cst_7 [1] : vector<16x16xf32> to vector<16xf32>
    %15 = vector.shape_cast %14 : vector<16xf32> to vector<16x1xf32>
    %16 = vector.broadcast %15 : vector<16x1xf32> to vector<16x16xf32>
    %17 = arith.subf %13, %16 : vector<16x16xf32>
    %18 = math.exp %17 : vector<16x16xf32>
    %cst_8 = arith.constant dense<0.000000e+00> : vector<16xf32>
    %19 = vector.multi_reduction <add>, %18, %cst_8 [1] : vector<16x16xf32> to vector<16xf32>
    %20 = vector.shape_cast %19 : vector<16xf32> to vector<16x1xf32>
    %21 = arith.truncf %18 : vector<16x16xf32> to vector<16x16xbf16>
    %cst_9 = arith.constant dense<0.000000e+00> : vector<16x128xf32>
    %22 = tpu.matmul %21, %10, %cst_9 {dimension_numbers = #tpu.dot_dimension_numbers<[1], [0], [0], [1], [0, 0, 1, 1], [], []>} : vector<16x16xbf16>, vector<16x128xbf16>, vector<16x128xf32> -> vector<16x128xf32>
    %23 = tpu.reciprocal %20 {approx = true} : vector<16x1xf32> -> vector<16x1xf32>
    %24 = vector.broadcast %23 : vector<16x1xf32> to vector<16x128xf32>
    %25 = arith.mulf %22, %24 : vector<16x128xf32>
    %26 = arith.truncf %25 : vector<16x128xf32> to vector<16x128xbf16>
    %c0_10 = arith.constant 0 : index
    %c0_11 = arith.constant 0 : index
    %27 = vector.load %arg15[%c0_10, %c0_11] : memref<32x256xbf16, #tpu.memory_space<vmem>>, vector<16x128xbf16>
    tpu.vector_store %arg15[%c0_10, %c0_11], %26 {strides = array<i32>} : memref<32x256xbf16, #tpu.memory_space<vmem>>, vector<16x128xbf16>,
    %28 = vector.extract_strided_slice %7 {offsets = [0, 128], sizes = [16, 128], strides = [1, 1]} : vector<32x768xbf16> to vector<16x128xbf16>
    %29 = vector.extract_strided_slice %7 {offsets = [0, 384], sizes = [16, 128], strides = [1, 1]} : vector<32x768xbf16> to vector<16x128xbf16>
    %30 = vector.extract_strided_slice %7 {offsets = [0, 640], sizes = [16, 128], strides = [1, 1]} : vector<32x768xbf16> to vector<16x128xbf16>
    %cst_12 = arith.constant dense<0.000000e+00> : vector<16x16xf32>
    %31 = tpu.matmul %28, %29, %cst_12 {dimension_numbers = #tpu.dot_dimension_numbers<[1], [1], [0], [0], [0, 0, 1, 0], [], []>} : vector<16x128xbf16>, vector<16x128xbf16>, vector<16x16xf32> -> vector<16x16xf32>
    %cst_13 = arith.constant 0.0883883461 : f32
    %32 = vector.broadcast %cst_13 : f32 to vector<16x16xf32>
    %33 = arith.mulf %31, %32 : vector<16x16xf32>
    %cst_14 = arith.constant dense<0xFF800000> : vector<16xf32>
    %34 = vector.multi_reduction <maximumf>, %33, %cst_14 [1] : vector<16x16xf32> to vector<16xf32>
    %35 = vector.shape_cast %34 : vector<16xf32> to vector<16x1xf32>
    %36 = vector.broadcast %35 : vector<16x1xf32> to vector<16x16xf32>
    %37 = arith.subf %33, %36 : vector<16x16xf32>
    %38 = math.exp %37 : vector<16x16xf32>
    %cst_15 = arith.constant dense<0.000000e+00> : vector<16xf32>
    %39 = vector.multi_reduction <add>, %38, %cst_15 [1] : vector<16x16xf32> to vector<16xf32>
    %40 = vector.shape_cast %39 : vector<16xf32> to vector<16x1xf32>
    %41 = arith.truncf %38 : vector<16x16xf32> to vector<16x16xbf16>
    %cst_16 = arith.constant dense<0.000000e+00> : vector<16x128xf32>
    %42 = tpu.matmul %41, %30, %cst_16 {dimension_numbers = #tpu.dot_dimension_numbers<[1], [0], [0], [1], [0, 0, 1, 1], [], []>} : vector<16x16xbf16>, vector<16x128xbf16>, vector<16x128xf32> -> vector<16x128xf32>
    %43 = tpu.reciprocal %40 {approx = true} : vector<16x1xf32> -> vector<16x1xf32>
    %44 = vector.broadcast %43 : vector<16x1xf32> to vector<16x128xf32>
    %45 = arith.mulf %42, %44 : vector<16x128xf32>
    %46 = arith.truncf %45 : vector<16x128xf32> to vector<16x128xbf16>
    %c0_17 = arith.constant 0 : index
    %c128 = arith.constant 128 : index
    %47 = vector.load %arg15[%c0_17, %c128] : memref<32x256xbf16, #tpu.memory_space<vmem>>, vector<16x128xbf16>
    tpu.vector_store %arg15[%c0_17, %c128], %46 {strides = array<i32>} : memref<32x256xbf16, #tpu.memory_space<vmem>>, vector<16x128xbf16>,
    %48 = vector.extract_strided_slice %7 {offsets = [16, 0], sizes = [16, 128], strides = [1, 1]} : vector<32x768xbf16> to vector<16x128xbf16>
    %49 = vector.extract_strided_slice %7 {offsets = [16, 256], sizes = [16, 128], strides = [1, 1]} : vector<32x768xbf16> to vector<16x128xbf16>
    %50 = vector.extract_strided_slice %7 {offsets = [16, 512], sizes = [16, 128], strides = [1, 1]} : vector<32x768xbf16> to vector<16x128xbf16>
    %cst_18 = arith.constant dense<0.000000e+00> : vector<16x16xf32>
    %51 = tpu.matmul %48, %49, %cst_18 {dimension_numbers = #tpu.dot_dimension_numbers<[1], [1], [0], [0], [0, 0, 1, 0], [], []>} : vector<16x128xbf16>, vector<16x128xbf16>, vector<16x16xf32> -> vector<16x16xf32>
    %cst_19 = arith.constant 0.0883883461 : f32
    %52 = vector.broadcast %cst_19 : f32 to vector<16x16xf32>
    %53 = arith.mulf %51, %52 : vector<16x16xf32>
    %cst_20 = arith.constant dense<0xFF800000> : vector<16xf32>
    %54 = vector.multi_reduction <maximumf>, %53, %cst_20 [1] : vector<16x16xf32> to vector<16xf32>
    %55 = vector.shape_cast %54 : vector<16xf32> to vector<16x1xf32>
    %56 = vector.broadcast %55 : vector<16x1xf32> to vector<16x16xf32>
    %57 = arith.subf %53, %56 : vector<16x16xf32>
    %58 = math.exp %57 : vector<16x16xf32>
    %cst_21 = arith.constant dense<0.000000e+00> : vector<16xf32>
    %59 = vector.multi_reduction <add>, %58, %cst_21 [1] : vector<16x16xf32> to vector<16xf32>
    %60 = vector.shape_cast %59 : vector<16xf32> to vector<16x1xf32>
    %61 = arith.truncf %58 : vector<16x16xf32> to vector<16x16xbf16>
    %cst_22 = arith.constant dense<0.000000e+00> : vector<16x128xf32>
    %62 = tpu.matmul %61, %50, %cst_22 {dimension_numbers = #tpu.dot_dimension_numbers<[1], [0], [0], [1], [0, 0, 1, 1], [], []>} : vector<16x16xbf16>, vector<16x128xbf16>, vector<16x128xf32> -> vector<16x128xf32>
    %63 = tpu.reciprocal %60 {approx = true} : vector<16x1xf32> -> vector<16x1xf32>
    %64 = vector.broadcast %63 : vector<16x1xf32> to vector<16x128xf32>
    %65 = arith.mulf %62, %64 : vector<16x128xf32>
    %66 = arith.truncf %65 : vector<16x128xf32> to vector<16x128xbf16>
    %c16 = arith.constant 16 : index
    %c0_23 = arith.constant 0 : index
    %67 = vector.load %arg15[%c16, %c0_23] : memref<32x256xbf16, #tpu.memory_space<vmem>>, vector<16x128xbf16>
    tpu.vector_store %arg15[%c16, %c0_23], %66 {strides = array<i32>} : memref<32x256xbf16, #tpu.memory_space<vmem>>, vector<16x128xbf16>,
    %68 = vector.extract_strided_slice %7 {offsets = [16, 128], sizes = [16, 128], strides = [1, 1]} : vector<32x768xbf16> to vector<16x128xbf16>
    %69 = vector.extract_strided_slice %7 {offsets = [16, 384], sizes = [16, 128], strides = [1, 1]} : vector<32x768xbf16> to vector<16x128xbf16>
    %70 = vector.extract_strided_slice %7 {offsets = [16, 640], sizes = [16, 128], strides = [1, 1]} : vector<32x768xbf16> to vector<16x128xbf16>
    %cst_24 = arith.constant dense<0.000000e+00> : vector<16x16xf32>
    %71 = tpu.matmul %68, %69, %cst_24 {dimension_numbers = #tpu.dot_dimension_numbers<[1], [1], [0], [0], [0, 0, 1, 0], [], []>} : vector<16x128xbf16>, vector<16x128xbf16>, vector<16x16xf32> -> vector<16x16xf32>
    %cst_25 = arith.constant 0.0883883461 : f32
    %72 = vector.broadcast %cst_25 : f32 to vector<16x16xf32>
    %73 = arith.mulf %71, %72 : vector<16x16xf32>
    %cst_26 = arith.constant dense<0xFF800000> : vector<16xf32>
    %74 = vector.multi_reduction <maximumf>, %73, %cst_26 [1] : vector<16x16xf32> to vector<16xf32>
    %75 = vector.shape_cast %74 : vector<16xf32> to vector<16x1xf32>
    %76 = vector.broadcast %75 : vector<16x1xf32> to vector<16x16xf32>
    %77 = arith.subf %73, %76 : vector<16x16xf32>
    %78 = math.exp %77 : vector<16x16xf32>
    %cst_27 = arith.constant dense<0.000000e+00> : vector<16xf32>
    %79 = vector.multi_reduction <add>, %78, %cst_27 [1] : vector<16x16xf32> to vector<16xf32>
    %80 = vector.shape_cast %79 : vector<16xf32> to vector<16x1xf32>
    %81 = arith.truncf %78 : vector<16x16xf32> to vector<16x16xbf16>
    %cst_28 = arith.constant dense<0.000000e+00> : vector<16x128xf32>
    %82 = tpu.matmul %81, %70, %cst_28 {dimension_numbers = #tpu.dot_dimension_numbers<[1], [0], [0], [1], [0, 0, 1, 1], [], []>} : vector<16x16xbf16>, vector<16x128xbf16>, vector<16x128xf32> -> vector<16x128xf32>
    %83 = tpu.reciprocal %80 {approx = true} : vector<16x1xf32> -> vector<16x1xf32>
    %84 = vector.broadcast %83 : vector<16x1xf32> to vector<16x128xf32>
    %85 = arith.mulf %82, %84 : vector<16x128xf32>
    %86 = arith.truncf %85 : vector<16x128xf32> to vector<16x128xbf16>
    %c16_29 = arith.constant 16 : index
    %c128_30 = arith.constant 128 : index
    %87 = vector.load %arg15[%c16_29, %c128_30] : memref<32x256xbf16, #tpu.memory_space<vmem>>, vector<16x128xbf16>
    tpu.vector_store %arg15[%c16_29, %c128_30], %86 {strides = array<i32>} : memref<32x256xbf16, #tpu.memory_space<vmem>>, vector<16x128xbf16>,
    %c0_31 = arith.constant 0 : index
    %c0_32 = arith.constant 0 : index
    %88 = vector.load %arg15[%c0_31, %c0_32] : memref<32x256xbf16, #tpu.memory_space<vmem>>, vector<32x256xbf16>
    %c0_33 = arith.constant 0 : index
    %c0_34 = arith.constant 0 : index
    %89 = vector.load %arg4[%c0_33, %c0_34] : memref<256x256xbf16, #tpu.memory_space<vmem>>, vector<256x256xbf16>
    %cst_35 = arith.constant dense<0.000000e+00> : vector<32x256xf32>
    %90 = tpu.matmul %88, %89, %cst_35 {dimension_numbers = #tpu.dot_dimension_numbers<[1], [0], [0], [1], [0, 0, 1, 1], [], []>} : vector<32x256xbf16>, vector<256x256xbf16>, vector<32x256xf32> -> vector<32x256xf32>
    %c0_36 = arith.constant 0 : index
    %c0_37 = arith.constant 0 : index
    %91 = vector.load %arg5[%c0_36, %c0_37] : memref<1x256xf32, #tpu.memory_space<vmem>>, vector<1x256xf32>
    %92 = vector.broadcast %91 : vector<1x256xf32> to vector<32x256xf32>
    %93 = arith.addf %90, %92 : vector<32x256xf32>
    %94 = arith.addf %0, %93 : vector<32x256xf32>
    %cst_38 = arith.constant dense<0.000000e+00> : vector<32xf32>
    %95 = vector.multi_reduction <add>, %94, %cst_38 [1] : vector<32x256xf32> to vector<32xf32>
    %96 = vector.shape_cast %95 : vector<32xf32> to vector<32x1xf32>
    %cst_39 = arith.constant 2.560000e+02 : f32
    %97 = vector.broadcast %cst_39 : f32 to vector<32x1xf32>
    %98 = arith.divf %96, %97 : vector<32x1xf32>
    %99 = vector.broadcast %98 : vector<32x1xf32> to vector<32x256xf32>
    %100 = arith.subf %94, %99 : vector<32x256xf32>
    %101 = arith.mulf %100, %100 : vector<32x256xf32>
    %cst_40 = arith.constant dense<0.000000e+00> : vector<32xf32>
    %102 = vector.multi_reduction <add>, %101, %cst_40 [1] : vector<32x256xf32> to vector<32xf32>
    %103 = vector.shape_cast %102 : vector<32xf32> to vector<32x1xf32>
    %cst_41 = arith.constant 2.560000e+02 : f32
    %104 = vector.broadcast %cst_41 : f32 to vector<32x1xf32>
    %105 = arith.divf %103, %104 : vector<32x1xf32>
    %106 = vector.broadcast %98 : vector<32x1xf32> to vector<32x256xf32>
    %107 = arith.subf %94, %106 : vector<32x256xf32>
    %cst_42 = arith.constant 9.99999974E-6 : f32
    %108 = vector.broadcast %cst_42 : f32 to vector<32x1xf32>
    %109 = arith.addf %105, %108 : vector<32x1xf32>
    %110 = math.rsqrt %109 : vector<32x1xf32>
    %111 = vector.broadcast %110 : vector<32x1xf32> to vector<32x256xf32>
    %112 = arith.mulf %107, %111 : vector<32x256xf32>
    %c0_43 = arith.constant 0 : index
    %c0_44 = arith.constant 0 : index
    %113 = vector.load %arg10[%c0_43, %c0_44] : memref<1x256xf32, #tpu.memory_space<vmem>>, vector<1x256xf32>
    %114 = vector.broadcast %113 : vector<1x256xf32> to vector<32x256xf32>
    %115 = arith.mulf %112, %114 : vector<32x256xf32>
    %c0_45 = arith.constant 0 : index
    %c0_46 = arith.constant 0 : index
    %116 = vector.load %arg11[%c0_45, %c0_46] : memref<1x256xf32, #tpu.memory_space<vmem>>, vector<1x256xf32>
    %117 = vector.broadcast %116 : vector<1x256xf32> to vector<32x256xf32>
    %118 = arith.addf %115, %117 : vector<32x256xf32>
    %119 = arith.truncf %118 : vector<32x256xf32> to vector<32x256xbf16>
    %c0_47 = arith.constant 0 : index
    %c0_48 = arith.constant 0 : index
    %120 = vector.load %arg6[%c0_47, %c0_48] : memref<256x512xbf16, #tpu.memory_space<vmem>>, vector<256x512xbf16>
    %cst_49 = arith.constant dense<0.000000e+00> : vector<32x512xf32>
    %121 = tpu.matmul %119, %120, %cst_49 {dimension_numbers = #tpu.dot_dimension_numbers<[1], [0], [0], [1], [0, 0, 1, 1], [], []>} : vector<32x256xbf16>, vector<256x512xbf16>, vector<32x512xf32> -> vector<32x512xf32>
    %c0_50 = arith.constant 0 : index
    %c0_51 = arith.constant 0 : index
    %122 = vector.load %arg7[%c0_50, %c0_51] : memref<1x512xf32, #tpu.memory_space<vmem>>, vector<1x512xf32>
    %123 = vector.broadcast %122 : vector<1x512xf32> to vector<32x512xf32>
    %124 = arith.addf %121, %123 : vector<32x512xf32>
    %cst_52 = arith.constant 0.000000e+00 : f32
    %125 = vector.broadcast %cst_52 : f32 to vector<32x512xf32>
    %126 = arith.maximumf %124, %125 : vector<32x512xf32>
    %127 = arith.truncf %126 : vector<32x512xf32> to vector<32x512xbf16>
    %c0_53 = arith.constant 0 : index
    %c0_54 = arith.constant 0 : index
    %128 = vector.load %arg8[%c0_53, %c0_54] : memref<512x256xbf16, #tpu.memory_space<vmem>>, vector<512x256xbf16>
    %cst_55 = arith.constant dense<0.000000e+00> : vector<32x256xf32>
    %129 = tpu.matmul %127, %128, %cst_55 {dimension_numbers = #tpu.dot_dimension_numbers<[1], [0], [0], [1], [0, 0, 1, 1], [], []>} : vector<32x512xbf16>, vector<512x256xbf16>, vector<32x256xf32> -> vector<32x256xf32>
    %c0_56 = arith.constant 0 : index
    %c0_57 = arith.constant 0 : index
    %130 = vector.load %arg9[%c0_56, %c0_57] : memref<1x256xf32, #tpu.memory_space<vmem>>, vector<1x256xf32>
    %131 = vector.broadcast %130 : vector<1x256xf32> to vector<32x256xf32>
    %132 = arith.addf %129, %131 : vector<32x256xf32>
    %133 = arith.addf %118, %132 : vector<32x256xf32>
    %cst_58 = arith.constant dense<0.000000e+00> : vector<32xf32>
    %134 = vector.multi_reduction <add>, %133, %cst_58 [1] : vector<32x256xf32> to vector<32xf32>
    %135 = vector.shape_cast %134 : vector<32xf32> to vector<32x1xf32>
    %cst_59 = arith.constant 2.560000e+02 : f32
    %136 = vector.broadcast %cst_59 : f32 to vector<32x1xf32>
    %137 = arith.divf %135, %136 : vector<32x1xf32>
    %138 = vector.broadcast %137 : vector<32x1xf32> to vector<32x256xf32>
    %139 = arith.subf %133, %138 : vector<32x256xf32>
    %140 = arith.mulf %139, %139 : vector<32x256xf32>
    %cst_60 = arith.constant dense<0.000000e+00> : vector<32xf32>
    %141 = vector.multi_reduction <add>, %140, %cst_60 [1] : vector<32x256xf32> to vector<32xf32>
    %142 = vector.shape_cast %141 : vector<32xf32> to vector<32x1xf32>
    %cst_61 = arith.constant 2.560000e+02 : f32
    %143 = vector.broadcast %cst_61 : f32 to vector<32x1xf32>
    %144 = arith.divf %142, %143 : vector<32x1xf32>
    %145 = vector.broadcast %137 : vector<32x1xf32> to vector<32x256xf32>
    %146 = arith.subf %133, %145 : vector<32x256xf32>
    %cst_62 = arith.constant 9.99999974E-6 : f32
    %147 = vector.broadcast %cst_62 : f32 to vector<32x1xf32>
    %148 = arith.addf %144, %147 : vector<32x1xf32>
    %149 = math.rsqrt %148 : vector<32x1xf32>
    %150 = vector.broadcast %149 : vector<32x1xf32> to vector<32x256xf32>
    %151 = arith.mulf %146, %150 : vector<32x256xf32>
    %c0_63 = arith.constant 0 : index
    %c0_64 = arith.constant 0 : index
    %152 = vector.load %arg12[%c0_63, %c0_64] : memref<1x256xf32, #tpu.memory_space<vmem>>, vector<1x256xf32>
    %153 = vector.broadcast %152 : vector<1x256xf32> to vector<32x256xf32>
    %154 = arith.mulf %151, %153 : vector<32x256xf32>
    %c0_65 = arith.constant 0 : index
    %c0_66 = arith.constant 0 : index
    %155 = vector.load %arg13[%c0_65, %c0_66] : memref<1x256xf32, #tpu.memory_space<vmem>>, vector<1x256xf32>
    %156 = vector.broadcast %155 : vector<1x256xf32> to vector<32x256xf32>
    %157 = arith.addf %154, %156 : vector<32x256xf32>
    %c0_67 = arith.constant 0 : index
    %c0_68 = arith.constant 0 : index
    %158 = vector.load %arg14[%c0_67, %c0_68] : memref<32x256xf32, #tpu.memory_space<vmem>>, vector<32x256xf32>
    tpu.vector_store %arg14[%c0_67, %c0_68], %157 {strides = array<i32>} : memref<32x256xf32, #tpu.memory_space<vmem>>, vector<32x256xf32>,
    return
  }
  func.func @transform_0(%arg0: i32) -> (i32, i32) {
    %c0_i32 = arith.constant 0 : i32
    %c0_i32_0 = arith.constant 0 : i32
    return %arg0, %c0_i32 : i32, i32
  }
  func.func @transform_1(%arg0: i32) -> (i32, i32) {
    %c0_i32 = arith.constant 0 : i32
    %c0_i32_0 = arith.constant 0 : i32
    %c0_i32_1 = arith.constant 0 : i32
    return %c0_i32, %c0_i32_0 : i32, i32
  }
  func.func @transform_2(%arg0: i32) -> (i32, i32) {
    %c0_i32 = arith.constant 0 : i32
    %c0_i32_0 = arith.constant 0 : i32
    %c0_i32_1 = arith.constant 0 : i32
    return %c0_i32, %c0_i32_0 : i32, i32
  }
  func.func @transform_3(%arg0: i32) -> (i32, i32) {
    %c0_i32 = arith.constant 0 : i32
    %c0_i32_0 = arith.constant 0 : i32
    %c0_i32_1 = arith.constant 0 : i32
    return %c0_i32, %c0_i32_0 : i32, i32
  }
  func.func @transform_4(%arg0: i32) -> (i32, i32) {
    %c0_i32 = arith.constant 0 : i32
    %c0_i32_0 = arith.constant 0 : i32
    %c0_i32_1 = arith.constant 0 : i32
    return %c0_i32, %c0_i32_0 : i32, i32
  }
  func.func @transform_5(%arg0: i32) -> (i32, i32) {
    %c0_i32 = arith.constant 0 : i32
    %c0_i32_0 = arith.constant 0 : i32
    %c0_i32_1 = arith.constant 0 : i32
    return %c0_i32, %c0_i32_0 : i32, i32
  }
  func.func @transform_6(%arg0: i32) -> (i32, i32) {
    %c0_i32 = arith.constant 0 : i32
    %c0_i32_0 = arith.constant 0 : i32
    %c0_i32_1 = arith.constant 0 : i32
    return %c0_i32, %c0_i32_0 : i32, i32
  }
  func.func @transform_7(%arg0: i32) -> (i32, i32) {
    %c0_i32 = arith.constant 0 : i32
    %c0_i32_0 = arith.constant 0 : i32
    %c0_i32_1 = arith.constant 0 : i32
    return %c0_i32, %c0_i32_0 : i32, i32
  }
  func.func @transform_8(%arg0: i32) -> (i32, i32) {
    %c0_i32 = arith.constant 0 : i32
    %c0_i32_0 = arith.constant 0 : i32
    %c0_i32_1 = arith.constant 0 : i32
    return %c0_i32, %c0_i32_0 : i32, i32
  }
  func.func @transform_9(%arg0: i32) -> (i32, i32) {
    %c0_i32 = arith.constant 0 : i32
    %c0_i32_0 = arith.constant 0 : i32
    %c0_i32_1 = arith.constant 0 : i32
    return %c0_i32, %c0_i32_0 : i32, i32
  }
  func.func @transform_10(%arg0: i32) -> (i32, i32) {
    %c0_i32 = arith.constant 0 : i32
    %c0_i32_0 = arith.constant 0 : i32
    %c0_i32_1 = arith.constant 0 : i32
    return %c0_i32, %c0_i32_0 : i32, i32
  }
  func.func @transform_11(%arg0: i32) -> (i32, i32) {
    %c0_i32 = arith.constant 0 : i32
    %c0_i32_0 = arith.constant 0 : i32
    %c0_i32_1 = arith.constant 0 : i32
    return %c0_i32, %c0_i32_0 : i32, i32
  }
  func.func @transform_12(%arg0: i32) -> (i32, i32) {
    %c0_i32 = arith.constant 0 : i32
    %c0_i32_0 = arith.constant 0 : i32
    %c0_i32_1 = arith.constant 0 : i32
    return %c0_i32, %c0_i32_0 : i32, i32
  }
  func.func @transform_13(%arg0: i32) -> (i32, i32) {
    %c0_i32 = arith.constant 0 : i32
    %c0_i32_0 = arith.constant 0 : i32
    return %arg0, %c0_i32 : i32, i32
  }
}

</mosaic_0001>

<bundles_post_ra>
// kernel: tpu_custom_call.1
= control target key start
LH: loop header
LB: loop body
LE: loop exit
PB: predicated region body
PF: predicated region fallthrough
CT: control target
= control target key end

     0   :  { %s5335_s0 = inlined_call_operand.hbm [shape: f32[64,256], index: 0, kind: input, shape index: {}]   ;;  %s5336_s1 = inlined_call_operand.hbm [shape: bf16[256,768], index: 1, kind: input, shape index: {}]   ;;  %s5337_s2 = inlined_call_operand.vmem [shape: f32[1,768], index: 2, kind: input, shape index: {}]   ;;  %s5338_s3 = inlined_call_operand.hbm [shape: bf16[256,256], index: 3, kind: input, shape index: {}]   ;;  %s5339_s4 = inlined_call_operand.vmem [shape: f32[1,256], index: 4, kind: input, shape index: {}]   ;;  %s5340_s5 = inlined_call_operand.hbm [shape: bf16[256,512], index: 5, kind: input, shape index: {}]   ;;  %s5341_s6 = inlined_call_operand.vmem [shape: f32[1,512], index: 6, kind: input, shape index: {}]   ;;  %s5342_s7 = inlined_call_operand.hbm [shape: bf16[512,256], index: 7, kind: input, shape index: {}]   ;;  %s5343_s8 = inlined_call_operand.vmem [shape: f32[1,256], index: 8, kind: input, shape index: {}]   ;;  %s5344_s9 = inlined_call_operand.vmem [shape: f32[1,256], index: 9, kind: input, shape index: {}]   ;;  %s5345_s10 = inlined_call_operand.vmem [shape: f32[1,256], index: 10, kind: input, shape index: {}]   ;;  %s5346_s11 = inlined_call_operand.vmem [shape: f32[1,256], index: 11, kind: input, shape index: {}]   ;;  %s5347_s12 = inlined_call_operand.vmem [shape: f32[1,256], index: 12, kind: input, shape index: {}]   ;;  %s5348_s13 = inlined_call_operand.hbm [shape: f32[64,256], index: 13, kind: output, shape index: {}]  }
   0x1   :  { %5357 = sst [smem:[#allocation19_spill]] %s5336_s1 }
   0x2   :  { %5358 = sst [smem:[#allocation20_spill]] %s5343_s8 }
   0x3   :  { %5359 = sst [smem:[#allocation21_spill]] %s5346_s11 }
   0x4   :  { %5360 = sst [smem:[#allocation22_spill]] %s5347_s12 }
   0x5   :  { %5361 = sst [smem:[#allocation23_spill]] %s5348_s13 }
   0x6   :  { %18 = vsyncpa [#allocation4], 0 }
   0x7   :  { %20 = vsyncpa [#allocation4 + $0x1], 0 }
   0x8   :  { %21 = vsyncpa [#allocation7], 0 }
   0x9   :  { %22 = vsyncpa [#allocation10], 0 }
   0xa   :  { %23 = vsyncpa [#allocation5], 0 }
   0xb   :  { %25 = vsyncpa [#allocation5 + $0x1], 0  ;;  %s4632_s25 = smov 0   ;;  %s4634_s26 = smov 0  }
   0xc   :  { %s4636_s27 = smov 0   ;;  %s4638_s28 = smov 0  }
   0xd LB: > { %5362 = sst [smem:[#allocation17_spill]] %s4532_s25  ;;  %s4653_s29 = sadd.s32 4294967295, %s4544_s28   ;;  %s4544_s28 = sphi %s4638_s28, %s5392_s28   ;;  %s4540_s27 = sphi %s4636_s27, %s5391_s27   ;;  %s4536_s26 = sphi %s4634_s26, %s5390_s26   ;;  %s4532_s25 = sphi %s4632_s25, %s5389_s25  }
   0xe   : > { %s3423_s30 = sadd.s32 4294967294, %s4544_s28   ;;  %p51_p0 = scmp.ne.s32.totalorder %s4536_s26, %s4532_s25 }
   0xf   : > { %p5351_p1 = scmp.eq.s32.totalorder %s4653_s29, 0  ;;  %p333_p3 = scmp.eq.s32.totalorder %s3423_s30, 1 }
  0x10   : > { %p3424_p5 = scmp.ge.s32.totalorder %s4544_s28, 1  ;;  %p340_p7 = scmp.lt.s32.totalorder %s4544_s28, 3 }
  0x11   : > { %p4662_p4 = por %p5351_p1, %p51_p0  ;;  %p4667_p6 = por %p333_p3, %p51_p0 }
  0x12   : > { %p4672_p8 = pnand %p3424_p5, %p340_p7  ;;  %s4546_s17 = smov [#allocation6]  }
  0x13   : > { %s5363_s14 = scalar_select %p4662_p4, 1, 0 }
  0x14   : > { %s5364_s15 = scalar_select %p4667_p6, 1, 0 }
  0x15   : > { %s5366_s16 = scalar_select %p4672_p8, 1, 0 }
  0x16   : > { %5365 = sst [smem:[#allocation18_spill]] %s5364_s15  ;;  %s352_s18 = sshll.u32 %s4546_s17, 4  ;;  %s4676_s18 = int_to_ptr.vmem [resolvable:$true] %s352_s18 }
  0x17   : > { %p3811_p9 = pneg %p4672_p8  ;;  %s4547_s20 = smov [#allocation9]  }
  0x18   : > { %s384_s21 = sshll.u32 %s4547_s20, 4  ;;  %s5368_s1 = sld [smem:[#allocation19_spill]]  ;;  %s4687_s21 = int_to_ptr.vmem [resolvable:$true] %s384_s21 }
  0x19   : > { %p4683_p11 = pnand %p3811_p9, %p5351_p1 }
  0x1b   : > { %p4697_p13 = pneg %p4683_p11 }
  0x1e   : > { %s4328_s24 = scalar_lea.hbm %s5368_s1, 12288 }
  0x1f   : > { %p4329_p12 = scmp.ne.s32.totalorder %s5368_s1, %s4328_s24  ;;  %p4335_p5 = scmp.lt.u32.totalorder %s4328_s24, %s5368_s1 }
  0x21   : > { %p4331_p0 = pnand %p4697_p13, %p4329_p12 }
  0x23   : > { %p4332_p3 = pneg %p4331_p0 }
  0x25   : > { %p4337_p7 = pnand %p4335_p5, %p4332_p3 }
  0x27   : > { %4340 = shalt.err (!%p4337_p7)
}
  0x28   : > { %s4341_s22 = scalar_lea.vmem %s4676_s18, 12288  ;;  %p4349_p2 = scmp.lt.s32.totalorder %s4676_s18, %s4676_s18 }
  0x29   : > { %p4342_p9 = scmp.ne.s32.totalorder %s4676_s18, %s4341_s22  ;;  %p4350_p6 = scmp.lt.s32.totalorder %s4341_s22, %s4341_s22 }
  0x2b   : > { %p4344_p10 = pnand %p4342_p9, %p4697_p13  ;;  %p4351_p12 = por %p4350_p6, %p4349_p2 }
  0x2d   : > { %p4345_p1 = pneg %p4344_p10 }
  0x2f   : > { %p4352_p0 = pnand %p4351_p12, %p4345_p1 }
  0x31   : > { %4355 = shalt.err (!%p4352_p0)
}
  0x32   : > { %s4548_s23 = smov 384   ;;  %s4549_s25 = smov 24  }
  0x33   : > { %3814 = dma.hbm_to_vmem [thread:$0]  (!%p4683_p11), %s5368_s1, 12288, %s4676_s18, [#allocation7], %s4548_s23, %s4548_s23, %s4549_s25  }
  0x34   : > { %s4356_s13 = scalar_lea.hbm %s5340_s5, 8192 }
  0x35   : > { %p4357_p2 = scmp.ne.s32.totalorder %s5340_s5, %s4356_s13  ;;  %p4363_p10 = scmp.lt.u32.totalorder %s4356_s13, %s5340_s5 }
  0x37   : > { %p4359_p1 = pnand %p4357_p2, %p4697_p13 }
  0x39   : > { %p4360_p6 = pneg %p4359_p1 }
  0x3b   : > { %p4365_p3 = pnand %p4363_p10, %p4360_p6 }
  0x3d   : > { %4368 = shalt.err (!%p4365_p3)
}
  0x3e   : > { %s4369_s18 = scalar_lea.vmem %s4687_s21, 8192  ;;  %p4377_p12 = scmp.lt.s32.totalorder %s4687_s21, %s4687_s21 }
  0x3f   : > { %p4370_p5 = scmp.ne.s32.totalorder %s4687_s21, %s4369_s18  ;;  %p4378_p0 = scmp.lt.s32.totalorder %s4369_s18, %s4369_s18 }
  0x41   : > { %p4372_p7 = pnand %p4370_p5, %p4697_p13  ;;  %p4379_p2 = por %p4378_p0, %p4377_p12 }
  0x43   : > { %p4373_p9 = pneg %p4372_p7 }
  0x45   : > { %p4380_p1 = pnand %p4379_p2, %p4373_p9 }
  0x47   : > { %4383 = shalt.err (!%p4380_p1)
}
  0x48   : > { %s5355_s11 = smov 256   ;;  %s5356_s8 = smov 16  }
  0x49   : > { %3820 = dma.hbm_to_vmem [thread:$0]  (!%p4683_p11), %s5340_s5, 8192, %s4687_s21, [#allocation10], %s5355_s11, %s5355_s11, %s5356_s8  }
  0x4a   : > { %s4552_s23 = smov [#allocation8]   ;;  %s4384_s17 = scalar_lea.hbm %s5338_s3, 4096 }
  0x4b   : > { %s368_s25 = sshll.u32 %s4552_s23, 4  ;;  %p4385_p6 = scmp.ne.s32.totalorder %s5338_s3, %s4384_s17  ;;  %s369_s25 = int_to_ptr.vmem [resolvable:$true] %s368_s25 }
  0x4c   : > { %p4391_p5 = scmp.lt.u32.totalorder %s4384_s17, %s5338_s3 }
  0x4d   : > { %p4387_p10 = pnand %p4385_p6, %p4697_p13 }
  0x4f   : > { %p4388_p3 = pneg %p4387_p10 }
  0x51   : > { %p4393_p7 = pnand %p4391_p5, %p4388_p3 }
  0x53   : > { %4396 = shalt.err (!%p4393_p7)
}
  0x54   : > { %s4397_s21 = scalar_lea.vmem %s369_s25, 4096  ;;  %p4405_p2 = scmp.lt.s32.totalorder %s369_s25, %s369_s25 }
  0x55   : > { %p4398_p9 = scmp.ne.s32.totalorder %s369_s25, %s4397_s21  ;;  %p4406_p1 = scmp.lt.s32.totalorder %s4397_s21, %s4397_s21 }
  0x57   : > { %p4400_p12 = pnand %p4398_p9, %p4697_p13  ;;  %p4407_p4 = por %p4406_p1, %p4405_p2 }
  0x59   : > { %p4401_p0 = pneg %p4400_p12 }
  0x5b   : > { %p4408_p8 = pnand %p4407_p4, %p4401_p0 }
  0x5d   : > { %4411 = shalt.err (!%p4408_p8)
}
  0x5e   : > { %s4553_s12 = smov 128   ;;  %s4554_s13 = smov 8  }
  0x5f   : > { %3817 = dma.hbm_to_vmem [thread:$0]  (!%p4683_p11), %s5338_s3, 4096, %s369_s25, [#allocation7], %s4553_s12, %s4553_s12, %s4554_s13  }
  0x60   : > { %s4555_s24 = smov [#allocation11]   ;;  %s4412_s22 = scalar_lea.hbm %s5342_s7, 8192 }
  0x61   : > { %s400_s30 = sshll.u32 %s4555_s24, 4  ;;  %p4413_p4 = scmp.ne.s32.totalorder %s5342_s7, %s4412_s22  ;;  %s401_s30 = int_to_ptr.vmem [resolvable:$true] %s400_s30 }
  0x62   : > { %p4419_p10 = scmp.lt.u32.totalorder %s4412_s22, %s5342_s7 }
  0x63   : > { %p4415_p8 = pnand %p4413_p4, %p4697_p13 }
  0x65   : > { %p4416_p6 = pneg %p4415_p8 }
  0x67   : > { %p4421_p3 = pnand %p4419_p10, %p4416_p6 }
  0x69   : > { %4424 = shalt.err (!%p4421_p3)
}
  0x6a   : > { %s4425_s25 = scalar_lea.vmem %s401_s30, 8192  ;;  %p4433_p12 = scmp.lt.s32.totalorder %s401_s30, %s401_s30 }
  0x6b   : > { %p4426_p5 = scmp.ne.s32.totalorder %s401_s30, %s4425_s25  ;;  %p4434_p0 = scmp.lt.s32.totalorder %s4425_s25, %s4425_s25 }
  0x6d   : > { %p4428_p7 = pnand %p4426_p5, %p4697_p13  ;;  %p4435_p2 = por %p4434_p0, %p4433_p12 }
  0x6f   : > { %p4429_p9 = pneg %p4428_p7 }
  0x71   : > { %p4436_p1 = pnand %p4435_p2, %p4429_p9 }
  0x73   : > { %4439 = shalt.err (!%p4436_p1)
}
  0x74   : > { %3823 = dma.hbm_to_vmem [thread:$0]  (!%p4683_p11), %s5342_s7, 8192, %s401_s30, [#allocation10], %s4553_s12, %s4553_s12, %s4554_s13  }
  0x75   : > { %s4781_s15 = sadd.s32 1, %s4544_s28   ;;  %s38_s11 = sadd.s32 1, %s4540_s27 }
  0x76   : > { %s35_s19 = ssub.s32 %s4544_s28, %s4781_s15  ;;  %p45_p13 = scmp.ne.s32.totalorder %s4540_s27, %s4536_s26 }
  0x77   : > { %p36_p4 = scmp.eq.s32.totalorder %s35_s19, 0  ;;  %p46_p8 = scmp.eq.s32.totalorder %s4544_s28, 0 }
  0x78   : > { %p5370_p6 = scmp.eq.s32.totalorder %s4653_s29, 1  ;;  %p3836_p3 = scmp.lt.s32.totalorder %s4544_s28, 2 }
  0x79   : > { %s4797_s24 = scalar_select %p36_p4, %s4540_s27, %s38_s11  }
  0x7a   : > { %p4791_p10 = por %p5370_p6, %p45_p13  ;;  %p47_p5 = por %p46_p8, %p45_p13 }
  0x7b   : > { %s429_s17 = sand.u32 1, %s4540_s27   ;;  %s3708_s12 = sshll.u32 %s4544_s28, 10 }
  0x7c   : > { %s3430_s20 = sshll.u32 %s429_s17, 6  ;;  %s4804_s22 = scalar_lea.hbm %s5335_s0, %s3708_s12 }
  0x7d   : > { %s433_s18 = scalar_lea.vmem [#allocation3], %s3430_s20  ;;  %p4808_p11 = pnand %p3836_p3, %p47_p5 }
  0x7e   : > { %s441_s21 = sshll.u32 %s433_s18, 4  ;;  %s4812_s1 = scalar_lea.sflag [#allocation4], %s429_s17  ;;  %s4806_s21 = int_to_ptr.vmem [resolvable:$true] %s441_s21 }
  0x7f   : > { %s4440_s23 = scalar_lea.hbm %s4804_s22, 1024  ;;  %p4442_p9 = pneg %p4808_p11 }
  0x80   : > { %p4441_p7 = scmp.ne.s32.totalorder %s4804_s22, %s4440_s23  ;;  %s4445_s20 = scalar_lea.hbm %s5335_s0, 2048 }
  0x81   : > { %p4446_p2 = scmp.lt.u32.totalorder %s4804_s22, %s5335_s0  ;;  %p4447_p1 = scmp.lt.u32.totalorder %s4445_s20, %s4440_s23 }
  0x82   : > { %p4443_p12 = pnand %p4442_p9, %p4441_p7  ;;  %p4449_p4 = scmp.lt.u32.totalorder %s4440_s23, %s4804_s22 }
  0x83   : > { %p4448_p13 = por %p4447_p1, %p4446_p2 }
  0x84   : > { %p4444_p0 = pneg %p4443_p12 }
  0x85   : > { %p4450_p8 = por %p4449_p4, %p4448_p13 }
  0x87   : > { %p4451_p6 = pnand %p4450_p8, %p4444_p0 }
  0x89   : > { %4454 = shalt.err (!%p4451_p6)
}
  0x8a   : > { %s4455_s17 = scalar_lea.vmem %s4806_s21, 1024  ;;  %s4556_s30 = smov [#allocation3]  }
  0x8b   : > { %p4456_p3 = scmp.ne.s32.totalorder %s4806_s21, %s4455_s17  ;;  %s4460_s18 = sshll.u32 %s4556_s30, 4  ;;  %s4461_s18 = int_to_ptr.vmem [resolvable:$false] %s4460_s18 }
  0x8c   : > { %s4462_s11 = scalar_lea.vmem %s4461_s18, 2048  ;;  %p4463_p12 = scmp.lt.s32.totalorder %s4806_s21, %s4461_s18 }
  0x8d   : > { %p4458_p5 = pnand %p4456_p3, %p4442_p9  ;;  %p4464_p2 = scmp.lt.s32.totalorder %s4462_s11, %s4455_s17 }
  0x8f   : > { %p4459_p7 = pneg %p4458_p5  ;;  %p4465_p1 = por %p4464_p2, %p4463_p12 }
  0x91   : > { %p4466_p13 = pnand %p4465_p1, %p4459_p7 }
  0x93   : > { %4469 = shalt.err (!%p4466_p13)
}
  0x94   : > { %s5373_s23 = smov 16   ;;  %s5374_s19 = smov 256  }
  0x95   : > { %3827 = dma.hbm_to_vmem [thread:$0]  (!%p4808_p11), %s4804_s22, 1024, %s4806_s21, %s4812_s1, %s5374_s19, %s5374_s19, %s5373_s23  }
  0x96   : > { %p5375_p9 = scmp.ne.s32.totalorder %s5366_s16, 0 }
  0x97   : > { %s4846_s20 = sand.u32 (!%p5375_p9), 1, %s4536_s26   ;;  %p5376_p0 = scmp.ne.s32.totalorder (!%p5375_p9), %s5363_s14, 0 }
  0x98   : > { %453 = sbr.rel (%p5375_p9) target bundleno = 3596 (0xe0c), region = 72  ;;  %s3435_s12 = sshll.u32 (!%p5375_p9), %s4846_s20, 6 }
  0x99   : > { %s456_s13 = scalar_lea.sflag (!%p5375_p9), [#allocation4], %s4846_s20  ;;  %s4852_s25 = scalar_lea.vmem (!%p5375_p9), [#allocation3], %s3435_s12 }
  0x9f   : > { %4515 = dma.done.wait (%p5376_p0), %s456_s13, 1024  }
  0xa0   : > { %4517 = vsyncadd (%p5376_p0), %s456_s13, 4294966272  ;;  %p5377_p11 = scmp.eq.s32.totalorder %s4653_s29, 0 }
  0xa2   : > { %4519 = dma.done.wait (%p5377_p11), [#allocation7], 16384   ;;  %p5378_p4 = pmov %p5377_p11 }
  0xa4   : > { %4521 = vsyncadd (%p5378_p4), [#allocation7], 4294950912  ;;  %p5379_p8 = pmov %p5378_p4 }
  0xa5   : > { %p5380_p6 = pmov %p5378_p4 }
  0xa6   : > { %4523 = dma.done.wait (%p5379_p8), [#allocation10], 16384  }
  0xa7   : > { %4525 = vsyncadd (%p5380_p6), [#allocation10], 4294950912  ;;  %v3888_v0 = vld [vmem:[#allocation6 + $0x4] ss:$24 sps:$4 sm:$0xff]   ;;  %v3890_v1 = vld [vmem:[#allocation6] ss:$24 sps:$4 sm:$0xff]  }
  0xa8   : > { %1141 = vmatprep.subr.bf16.mxu0 %v3888_v0  ;;  %v3891_v2 = vld [vmem:[#allocation6 + $0x34] ss:$24 sps:$4 sm:$0xff]   ;;  %v3893_v3 = vld [vmem:[#allocation6 + $0x30] ss:$24 sps:$4 sm:$0xff]   ;;  %v3894_v4 = vld [vmem:[#allocation6 + $0x64] ss:$24 sps:$4 sm:$0xff]  }
  0xa9   : > { %1142 = vmatpush1.bf16.msra.mxu0 %v3890_v1  ;;  %v3896_v5 = vld [vmem:[#allocation6 + $0x60] ss:$24 sps:$4 sm:$0xff]   ;;  %v3897_v6 = vld [vmem:[#allocation6 + $0x94] ss:$24 sps:$4 sm:$0xff]   ;;  %v3899_v7 = vld [vmem:[#allocation6 + $0x90] ss:$24 sps:$4 sm:$0xff]  }
  0xaa   : > { %1143 = vmatprep.subr.bf16.mxu0 %v3891_v2  ;;  %v3900_v8 = vld [vmem:[#allocation6 + $0xc4] ss:$24 sps:$4 sm:$0xff]   ;;  %v3902_v9 = vld [vmem:[#allocation6 + $0xc0] ss:$24 sps:$4 sm:$0xff]   ;;  %v3903_v10 = vld [vmem:[#allocation6 + $0xf4] ss:$24 sps:$4 sm:$0xff]  }
  0xab   : > { %v3905_v11 = vld [vmem:[#allocation6 + $0xf0] ss:$24 sps:$4 sm:$0xff]   ;;  %v3906_v12 = vld [vmem:[#allocation6 + $0x124] ss:$24 sps:$4 sm:$0xff]   ;;  %v3908_v16 = vld [vmem:[#allocation6 + $0x120] ss:$24 sps:$4 sm:$0xff]  }
  0xac   : > { %v522_v13 = vld [vmem:[%s4852_s25 + $0x8] sm:$0xff]  ;;  %v524_v14 = vld [vmem:[%s4852_s25 + $0x18] sm:$0xff]  ;;  %v521_v35 = vld [vmem:[%s4852_s25] sm:$0xff]  ;;  %vm4558_vm0 = vmmov 0   ;;  %vm1355_vm1 = vcmask 130048   ;;  %s5382_s22 = sld [smem:[#allocation21_spill]] }
  0xad   : > { %1144 = vmatpush1.bf16.msra.mxu0 %v3893_v3  ;;  %v4868_v15 = vpack.c.bf16 %v524_v14, %v522_v13  ;;  %v3909_v17 = vld [vmem:[#allocation6 + $0x154] ss:$24 sps:$4 sm:$0xff]   ;;  %v3911_v18 = vld [vmem:[#allocation6 + $0x150] ss:$24 sps:$4 sm:$0xff]   ;;  %v3912_v19 = vld [vmem:[#allocation6 + $0x184] ss:$24 sps:$4 sm:$0xff]  }
  0xae   : > { %1145 = vmatprep.subr.bf16.mxu0 %v3894_v4  ;;  %v3914_v20 = vld [vmem:[#allocation6 + $0x180] ss:$24 sps:$4 sm:$0xff]   ;;  %v3915_v21 = vld [vmem:[#allocation6 + $0x1b4] ss:$24 sps:$4 sm:$0xff]   ;;  %v3917_v22 = vld [vmem:[#allocation6 + $0x1b0] ss:$24 sps:$4 sm:$0xff]  }
  0xaf   : > { %1173 = vmatprep.mubr.bf16.mxu0 %v4868_v15  ;;  %v3918_v23 = vld [vmem:[#allocation6 + $0x1e4] ss:$24 sps:$4 sm:$0xff]   ;;  %v3920_v24 = vld [vmem:[#allocation6 + $0x1e0] ss:$24 sps:$4 sm:$0xff]   ;;  %v3921_v25 = vld [vmem:[#allocation6 + $0x214] ss:$24 sps:$4 sm:$0xff]  }
  0xb0   : > { %v3923_v26 = vld [vmem:[#allocation6 + $0x210] ss:$24 sps:$4 sm:$0xff]   ;;  %v3924_v27 = vld [vmem:[#allocation6 + $0x244] ss:$24 sps:$4 sm:$0xff]   ;;  %v3926_v28 = vld [vmem:[#allocation6 + $0x240] ss:$24 sps:$4 sm:$0xff]  }
  0xb1   : > { %1146 = vmatpush1.bf16.msra.mxu0 %v3896_v5  ;;  %v3927_v29 = vld [vmem:[#allocation6 + $0x274] ss:$24 sps:$4 sm:$0xff]   ;;  %v3929_v30 = vld [vmem:[#allocation6 + $0x270] ss:$24 sps:$4 sm:$0xff]   ;;  %v3930_v31 = vld [vmem:[#allocation6 + $0x2a4] ss:$24 sps:$4 sm:$0xff]  }
  0xb2   : > { %1147 = vmatprep.subr.bf16.mxu0 %v3897_v6  ;;  %v3932_v32 = vld [vmem:[#allocation6 + $0x2a0] ss:$24 sps:$4 sm:$0xff]   ;;  %v3933_v33 = vld [vmem:[#allocation6 + $0x2d4] ss:$24 sps:$4 sm:$0xff]   ;;  %v3935_v34 = vld [vmem:[#allocation6 + $0x2d0] ss:$24 sps:$4 sm:$0xff]  }
  0xb3   : > { %v523_v36 = vld [vmem:[%s4852_s25 + $0x10] sm:$0xff]  ;;  %v3938_v37 = vld [vmem:[#allocation6 + $0xc] ss:$24 sps:$4 sm:$0xff]   ;;  %v528_v39 = vld [vmem:[%s4852_s25 + $0x38] sm:$0xff]  ;;  %s5383_s17 = sld [smem:[#allocation22_spill]]  ;;  %s517_s30 = scalar_lea.vmem [#allocation12], %s3435_s12 }
  0xb4   : > { %v526_v38 = vld [vmem:[%s4852_s25 + $0x28] sm:$0xff]  ;;  %v4875_v41 = vpack.c.bf16 %v523_v36, %v521_v35  ;;  %v3941_v42 = vld [vmem:[#allocation6 + $0x3c] ss:$24 sps:$4 sm:$0xff]   ;;  %v3939_v44 = vld [vmem:[#allocation6 + $0x38] ss:$24 sps:$4 sm:$0xff]   ;;  %s3710_s18 = sshll.u32 %s4653_s29, 10 }
  0xb5   : > { %1148 = vmatpush1.bf16.msra.mxu0 %v3899_v7  ;;  %v3936_v40 = vld [vmem:[#allocation6 + $0x8] ss:$24 sps:$4 sm:$0xff]   ;;  %v4877_v43 = vpack.c.bf16 %v528_v39, %v526_v38  ;;  %v527_v46 = vld [vmem:[%s4852_s25 + $0x30] sm:$0xff]  ;;  %v3944_v47 = vld [vmem:[#allocation6 + $0x6c] ss:$24 sps:$4 sm:$0xff]   ;;  %s3312_s11 = sshll.u32 %s517_s30, 4  ;;  %s5291_s11 = int_to_ptr.vmem [resolvable:$true] %s3312_s11 }
  0xb6   : > { %1149 = vmatprep.subr.bf16.mxu0 %v3900_v8  ;;  %v525_v45 = vld [vmem:[%s4852_s25 + $0x20] sm:$0xff]  ;;  %v3947_v49 = vld [vmem:[#allocation6 + $0x9c] ss:$24 sps:$4 sm:$0xff]   ;;  %v3945_v51 = vld [vmem:[#allocation6 + $0x98] ss:$24 sps:$4 sm:$0xff]   ;;  %s5384_s19 = sld [smem:[#allocation23_spill]] }
  0xb7   : > { %v3942_v48 = vld [vmem:[#allocation6 + $0x68] ss:$24 sps:$4 sm:$0xff]   ;;  %v4883_v50 = vpack.c.bf16 %v527_v46, %v525_v45  ;;  %v3950_v52 = vld [vmem:[#allocation6 + $0xcc] ss:$24 sps:$4 sm:$0xff]   ;;  %v3953_v54 = vld [vmem:[#allocation6 + $0xfc] ss:$24 sps:$4 sm:$0xff]  }
  0xb8   : > { %v3948_v53 = vld [vmem:[#allocation6 + $0xc8] ss:$24 sps:$4 sm:$0xff]   ;;  %v3951_v55 = vld [vmem:[#allocation6 + $0xf8] ss:$24 sps:$4 sm:$0xff]   ;;  %v3956_v56 = vld [vmem:[#allocation6 + $0x12c] ss:$24 sps:$4 sm:$0xff]  }
  0xb9   : > { %1150 = vmatpush1.bf16.msra.mxu0 %v3902_v9  ;;  %v3954_v57 = vld [vmem:[#allocation6 + $0x128] ss:$24 sps:$4 sm:$0xff]   ;;  %v3959_v58 = vld [vmem:[#allocation6 + $0x15c] ss:$24 sps:$4 sm:$0xff]   ;;  %v3957_v59 = vld [vmem:[#allocation6 + $0x158] ss:$24 sps:$4 sm:$0xff]  }
  0xba   : > { %1151 = vmatprep.subr.bf16.mxu0 %v3903_v10  ;;  %v3962_v60 = vld [vmem:[#allocation6 + $0x18c] ss:$24 sps:$4 sm:$0xff]   ;;  %v3960_v61 = vld [vmem:[#allocation6 + $0x188] ss:$24 sps:$4 sm:$0xff]   ;;  %v3965_v62 = vld [vmem:[#allocation6 + $0x1bc] ss:$24 sps:$4 sm:$0xff]  }
  0xbb   : > { %v3963_v63 = vld [vmem:[#allocation6 + $0x1b8] ss:$24 sps:$4 sm:$0xff]   ;;  %v3968_v0 = vld [vmem:[#allocation6 + $0x1ec] ss:$24 sps:$4 sm:$0xff]   ;;  %v3966_v1 = vld [vmem:[#allocation6 + $0x1e8] ss:$24 sps:$4 sm:$0xff]  }
  0xbc   : > { %v3971_v2 = vld [vmem:[#allocation6 + $0x21c] ss:$24 sps:$4 sm:$0xff]   ;;  %v3969_v3 = vld [vmem:[#allocation6 + $0x218] ss:$24 sps:$4 sm:$0xff]   ;;  %v3974_v4 = vld [vmem:[#allocation6 + $0x24c] ss:$24 sps:$4 sm:$0xff]   ;;  %s5289_s13 = scalar_lea.hbm %s5384_s19, %s3710_s18 }
  0xbd   : > { %1152 = vmatpush1.bf16.msra.mxu0 %v3905_v11  ;;  %v3972_v5 = vld [vmem:[#allocation6 + $0x248] ss:$24 sps:$4 sm:$0xff]   ;;  %v3977_v6 = vld [vmem:[#allocation6 + $0x27c] ss:$24 sps:$4 sm:$0xff]   ;;  %v3975_v7 = vld [vmem:[#allocation6 + $0x278] ss:$24 sps:$4 sm:$0xff]  }
  0xbe   : > { %1153 = vmatprep.subr.bf16.mxu0 %v3906_v12  ;;  %v3980_v8 = vld [vmem:[#allocation6 + $0x2ac] ss:$24 sps:$4 sm:$0xff]   ;;  %v3978_v9 = vld [vmem:[#allocation6 + $0x2a8] ss:$24 sps:$4 sm:$0xff]   ;;  %v3983_v10 = vld [vmem:[#allocation6 + $0x2dc] ss:$24 sps:$4 sm:$0xff]  }
  0xbf   : > { %v3981_v11 = vld [vmem:[#allocation6 + $0x2d8] ss:$24 sps:$4 sm:$0xff]   ;;  %v4557_v12 = vmov 0.0   ;;  %v3986_v14 = vld [vmem:[#allocation6 + $0x14] ss:$24 sps:$4 sm:$0xff]   ;;  %s3298_s29 = scalar_lea.sflag [#allocation5], %s4846_s20 }
  0xc0   : > { %3727 = vmatprep.subr.bf16.mxu1 %v4557_v12  ;;  %3729 = vmatprep.mubr.msk.bf16.mxu1 %vm4558_vm0, %v4557_v12  ;;  %v3984_v13 = vld [vmem:[#allocation6 + $0x10] ss:$24 sps:$4 sm:$0xff]   ;;  %v4017_v39 = vld [vmem:[#allocation6 + $0x220] ss:$24 sps:$4 sm:$0xff]   ;;  %s4559_s14 = smov [#allocation12]  }
  0xc1   : > { %1154 = vmatpush1.bf16.msra.mxu0 %v3908_v16  ;;  %v3989_v16 = vld [vmem:[#allocation6 + $0x44] ss:$24 sps:$4 sm:$0xff]   ;;  %v4014_v36 = vld [vmem:[#allocation6 + $0x1f0] ss:$24 sps:$4 sm:$0xff]   ;;  %s4474_s16 = sshll.u32 %s4559_s14, 4  ;;  %s4475_s16 = int_to_ptr.vmem [resolvable:$false] %s4474_s16 }
  0xc2   : > { %1155 = vmatprep.subr.bf16.mxu0 %v3909_v17  ;;  %v3987_v17 = vld [vmem:[#allocation6 + $0x40] ss:$24 sps:$4 sm:$0xff]   ;;  %v4020_v46 = vld [vmem:[#allocation6 + $0x250] ss:$24 sps:$4 sm:$0xff]   ;;  %p4477_p12 = scmp.lt.s32.totalorder %s5291_s11, %s4475_s16 }
  0xc5   : > { %1156 = vmatpush1.bf16.msra.mxu0 %v3911_v18  ;;  %v3992_v18 = vld [vmem:[#allocation6 + $0x74] ss:$24 sps:$4 sm:$0xff]  }
  0xc6   : > { %1157 = vmatprep.subr.bf16.mxu0 %v3912_v19  ;;  %v3990_v19 = vld [vmem:[#allocation6 + $0x70] ss:$24 sps:$4 sm:$0xff]  }
  0xc9   : > { %1158 = vmatpush1.bf16.msra.mxu0 %v3914_v20  ;;  %v3995_v20 = vld [vmem:[#allocation6 + $0xa4] ss:$24 sps:$4 sm:$0xff]  }
  0xca   : > { %1159 = vmatprep.subr.bf16.mxu0 %v3915_v21  ;;  %v3998_v21 = vld [vmem:[#allocation6 + $0xd4] ss:$24 sps:$4 sm:$0xff]  }
  0xcd   : > { %1160 = vmatpush1.bf16.msra.mxu0 %v3917_v22  ;;  %v3996_v22 = vld [vmem:[#allocation6 + $0xd0] ss:$24 sps:$4 sm:$0xff]  }
  0xce   : > { %1161 = vmatprep.subr.bf16.mxu0 %v3918_v23  ;;  %v4001_v23 = vld [vmem:[#allocation6 + $0x104] ss:$24 sps:$4 sm:$0xff]  }
  0xd1   : > { %1162 = vmatpush1.bf16.msra.mxu0 %v3920_v24  ;;  %v3999_v24 = vld [vmem:[#allocation6 + $0x100] ss:$24 sps:$4 sm:$0xff]  }
  0xd2   : > { %1163 = vmatprep.subr.bf16.mxu0 %v3921_v25  ;;  %v4004_v25 = vld [vmem:[#allocation6 + $0x134] ss:$24 sps:$4 sm:$0xff]  }
  0xd5   : > { %1164 = vmatpush1.bf16.msra.mxu0 %v3923_v26  ;;  %v4002_v26 = vld [vmem:[#allocation6 + $0x130] ss:$24 sps:$4 sm:$0xff]  }
  0xd6   : > { %1165 = vmatprep.subr.bf16.mxu0 %v3924_v27  ;;  %v4007_v27 = vld [vmem:[#allocation6 + $0x164] ss:$24 sps:$4 sm:$0xff]  }
  0xd9   : > { %1166 = vmatpush1.bf16.msra.mxu0 %v3926_v28  ;;  %v4005_v28 = vld [vmem:[#allocation6 + $0x160] ss:$24 sps:$4 sm:$0xff]  }
  0xda   : > { %1167 = vmatprep.subr.bf16.mxu0 %v3927_v29  ;;  %v4010_v29 = vld [vmem:[#allocation6 + $0x194] ss:$24 sps:$4 sm:$0xff]  }
  0xdd   : > { %1168 = vmatpush1.bf16.msra.mxu0 %v3929_v30  ;;  %v4008_v30 = vld [vmem:[#allocation6 + $0x190] ss:$24 sps:$4 sm:$0xff]  }
  0xde   : > { %1169 = vmatprep.subr.bf16.mxu0 %v3930_v31  ;;  %v4013_v31 = vld [vmem:[#allocation6 + $0x1c4] ss:$24 sps:$4 sm:$0xff]  }
  0xe1   : > { %1170 = vmatpush1.bf16.msra.mxu0 %v3932_v32  ;;  %v631_v32 = vlaneseq }
  0xe2   : > { %1171 = vmatprep.subr.bf16.mxu0 %v3933_v33  ;;  %v4011_v33 = vld [vmem:[#allocation6 + $0x1c0] ss:$24 sps:$4 sm:$0xff]  }
  0xe3   : > { %v4894_v35 = vshrl.u32 %v631_v32, 7 }
  0xe5   : > { %1172 = vmatpush1.bf16.msra.mxu0 %v3935_v34  ;;  %v4016_v34 = vld [vmem:[#allocation6 + $0x1f4] ss:$24 sps:$4 sm:$0xff]   ;;  %v4897_v38 = vsub.s32 0, %v4894_v35 }
  0xe6   : > { %1194 = vmatprep.subr.bf16.mxu0 %v3938_v37  ;;  %v4019_v37 = vld [vmem:[#allocation6 + $0x224] ss:$24 sps:$4 sm:$0xff]  }
  0xe8   : > { %1174 = vmatmul.mubr.bf16.vlgmr.msra.gmra.mrb[0].mxu0 %v4875_v41 }
  0xe9   : > { %1195 = vmatpush1.bf16.msra.mxu0 %v3936_v40  ;;  %1183 = vmatprep.mubr.bf16.mxu0 %v4877_v43  ;;  %v4902_v40 = vld [vmem:[%s5337_s2] sm:$0x3f] }
  0xea   : > { %1196 = vmatprep.subr.bf16.mxu0 %v3941_v42  ;;  %v4022_v42 = vld [vmem:[#allocation6 + $0x254] ss:$24 sps:$4 sm:$0xff]   ;;  %v634_v45 = vrot.slane %v4902_v40, %v4897_v38 }
  0xed   : > { %1197 = vmatpush1.bf16.msra.mxu0 %v3939_v44  ;;  %v4905_v44 = vsub.s32 1, %v4894_v35 }
  0xee   : > { %1198 = vmatprep.subr.bf16.mxu0 %v3944_v47  ;;  %v4025_v47 = vld [vmem:[#allocation6 + $0x284] ss:$24 sps:$4 sm:$0xff]  }
  0xf0   : > { %1184 = vmatmul.mubr.bf16.gmra.mrb[4].mxu0 %v4883_v50 }
  0xf1   : > { %1199 = vmatpush1.bf16.msra.mxu0 %v3942_v48  ;;  %1226 = vmatprep.mubr.bf16.mxu0 %v4868_v15 }
  0xf2   : > { %1200 = vmatprep.subr.bf16.mxu0 %v3947_v49  ;;  %v638_v49 = vrot.slane %v4902_v40, %v4905_v44 }
  0xf5   : > { %1201 = vmatpush1.bf16.msra.mxu0 %v3945_v51 }
  0xf6   : > { %1202 = vmatprep.subr.bf16.mxu0 %v3950_v52 }
  0xf9   : > { %1203 = vmatpush1.bf16.msra.mxu0 %v3948_v53  ;;  %v4023_v53 = vld [vmem:[#allocation6 + $0x280] ss:$24 sps:$4 sm:$0xff]  }
  0xfa   : > { %1204 = vmatprep.subr.bf16.mxu0 %v3953_v54 }
  0xfd   : > { %1205 = vmatpush1.bf16.msra.mxu0 %v3951_v55  ;;  %v4028_v55 = vld [vmem:[#allocation6 + $0x2b4] ss:$24 sps:$4 sm:$0xff]  }
  0xfe   : > { %1206 = vmatprep.subr.bf16.mxu0 %v3956_v56 }
 0x101   : > { %1207 = vmatpush1.bf16.msra.mxu0 %v3954_v57 }
 0x102   : > { %1208 = vmatprep.subr.bf16.mxu0 %v3959_v58 }
 0x105   : > { %1209 = vmatpush1.bf16.msra.mxu0 %v3957_v59 }
 0x106   : > { %1210 = vmatprep.subr.bf16.mxu0 %v3962_v60 }
 0x109   : > { %1211 = vmatpush1.bf16.msra.mxu0 %v3960_v61  ;;  %v4026_v61 = vld [vmem:[#allocation6 + $0x2b0] ss:$24 sps:$4 sm:$0xff]  }
 0x10a   : > { %1212 = vmatprep.subr.bf16.mxu0 %v3965_v62 }
 0x10d   : > { %1213 = vmatpush1.bf16.msra.mxu0 %v3963_v63  ;;  %v4031_v63 = vld [vmem:[#allocation6 + $0x2e4] ss:$24 sps:$4 sm:$0xff]  }
 0x10e   : > { %1214 = vmatprep.subr.bf16.mxu0 %v3968_v0 }
 0x111   : > { %1215 = vmatpush1.bf16.msra.mxu0 %v3966_v1 }
 0x112   : > { %1216 = vmatprep.subr.bf16.mxu0 %v3971_v2 }
 0x115   : > { %1217 = vmatpush1.bf16.msra.mxu0 %v3969_v3  ;;  %v4029_v3 = vld [vmem:[#allocation6 + $0x2e0] ss:$24 sps:$4 sm:$0xff]  }
 0x116   : > { %1218 = vmatprep.subr.bf16.mxu0 %v3974_v4 }
 0x119   : > { %1219 = vmatpush1.bf16.msra.mxu0 %v3972_v5 }
 0x11a   : > { %1220 = vmatprep.subr.bf16.mxu0 %v3977_v6 }
 0x11d   : > { %1221 = vmatpush1.bf16.msra.mxu0 %v3975_v7 }
 0x11e   : > { %1222 = vmatprep.subr.bf16.mxu0 %v3980_v8 }
 0x121   : > { %1223 = vmatpush1.bf16.msra.mxu0 %v3978_v9 }
 0x122   : > { %1224 = vmatprep.subr.bf16.mxu0 %v3983_v10 }
 0x125   : > { %1225 = vmatpush1.bf16.msra.mxu0 %v3981_v11  ;;  %v641_v11 = vsub.s32 2, %v4894_v35 }
 0x126   : > { %1247 = vmatprep.subr.bf16.mxu0 %v3986_v14 }
 0x127   : > { %v642_v14 = vrot.slane %v4902_v40, %v641_v11 }
 0x128   : > { %1227 = vmatmul.mubr.bf16.vlgmr.msra.gmra.mrb[8].mxu0 %v4875_v41 }
 0x129   : > { %1236 = vmatprep.mubr.bf16.mxu0 %v4877_v43  ;;  %1248 = vmatpush1.bf16.msra.mxu0 %v3984_v13  ;;  %v645_v13 = vsub.s32 3, %v4894_v35 }
 0x12a   : > { %1249 = vmatprep.subr.bf16.mxu0 %v3989_v16 }
 0x12d   : > { %1250 = vmatpush1.bf16.msra.mxu0 %v3987_v17  ;;  %v646_v17 = vrot.slane %v4902_v40, %v645_v13 }
 0x12e   : > { %1251 = vmatprep.subr.bf16.mxu0 %v3992_v18 }
 0x130   : > { %1237 = vmatmul.mubr.bf16.gmra.mrb[12].mxu0 %v4883_v50 }
 0x131   : > { %1279 = vmatprep.mubr.bf16.mxu0 %v4868_v15  ;;  %1252 = vmatpush1.bf16.msra.mxu0 %v3990_v19  ;;  %v3993_v15 = vld [vmem:[#allocation6 + $0xa0] ss:$24 sps:$4 sm:$0xff]  }
 0x132   : > { %1253 = vmatprep.subr.bf16.mxu0 %v3995_v20 }
 0x135   : > { %1254 = vmatpush1.bf16.msra.mxu0 %v3993_v15 }
 0x136   : > { %1255 = vmatprep.subr.bf16.mxu0 %v3998_v21 }
 0x139   : > { %1256 = vmatpush1.bf16.msra.mxu0 %v3996_v22 }
 0x13a   : > { %1257 = vmatprep.subr.bf16.mxu0 %v4001_v23 }
 0x13d   : > { %1258 = vmatpush1.bf16.msra.mxu0 %v3999_v24 }
 0x13e   : > { %1259 = vmatprep.subr.bf16.mxu0 %v4004_v25 }
 0x141   : > { %1260 = vmatpush1.bf16.msra.mxu0 %v4002_v26 }
 0x142   : > { %1261 = vmatprep.subr.bf16.mxu0 %v4007_v27 }
 0x145   : > { %1262 = vmatpush1.bf16.msra.mxu0 %v4005_v28 }
 0x146   : > { %1263 = vmatprep.subr.bf16.mxu0 %v4010_v29 }
 0x149   : > { %1264 = vmatpush1.bf16.msra.mxu0 %v4008_v30 }
 0x14a   : > { %1265 = vmatprep.subr.bf16.mxu0 %v4013_v31 }
 0x14d   : > { %1266 = vmatpush1.bf16.msra.mxu0 %v4011_v33 }
 0x14e   : > { %1267 = vmatprep.subr.bf16.mxu0 %v4016_v34 }
 0x151   : > { %1268 = vmatpush1.bf16.msra.mxu0 %v4014_v36 }
 0x152   : > { %1269 = vmatprep.subr.bf16.mxu0 %v4019_v37 }
 0x155   : > { %1270 = vmatpush1.bf16.msra.mxu0 %v4017_v39 }
 0x156   : > { %1271 = vmatprep.subr.bf16.mxu0 %v4022_v42 }
 0x159   : > { %1272 = vmatpush1.bf16.msra.mxu0 %v4020_v46 }
 0x15a   : > { %1273 = vmatprep.subr.bf16.mxu0 %v4025_v47  ;;  %v649_v47 = vsub.s32 4, %v4894_v35 }
 0x15d   : > { %1274 = vmatpush1.bf16.msra.mxu0 %v4023_v53 }
 0x15e   : > { %1275 = vmatprep.subr.bf16.mxu0 %v4028_v55 }
 0x161   : > { %1276 = vmatpush1.bf16.msra.mxu0 %v4026_v61 }
 0x162   : > { %1277 = vmatprep.subr.bf16.mxu0 %v4031_v63 }
 0x165   : > { %1278 = vmatpush1.bf16.msra.mxu0 %v4029_v3 }
 0x168   : > { %1280 = vmatmul.mubr.bf16.vlgmr.msra.gmra.mrb[16].mxu0 %v4875_v41 }
 0x169   : > { %1289 = vmatprep.mubr.bf16.mxu0 %v4877_v43 }
 0x170   : > { %1290 = vmatmul.mubr.bf16.gmra.mrb[20].mxu0 %v4883_v50 }
 0x1bb   : > { %v1175_v48 = vpop.f32.mrb[0].mxu0 }
 0x1bc   : > { %v1176_v51 = vadd.f32 %v1175_v48, %v634_v45  ;;  %v1177_v52 = vpop.f32.mrb[1].mxu0 }
 0x1bd   : > { %v1179_v54 = vpop.f32.mrb[2].mxu0  ;;  %v4911_v58 = vadd.f32 %v1177_v52, %v638_v49  ;;  %v4960_v52 = vrot.slane %v4902_v40, %v649_v47 }
 0x1be   : > { %v1180_v56 = vadd.f32 %v1179_v54, %v634_v45  ;;  %v1181_v57 = vpop.f32.mrb[3].mxu0 }
 0x1bf   : > { %v4913_v59 = vadd.f32 %v1181_v57, %v638_v49 }
 0x1c0   : > { %v1300_v60 = vpack.c.bf16 %v1180_v56, %v1176_v51 }
 0x1c1   : > { %v1301_v62 = vpack.c.bf16 %v4913_v59, %v4911_v58 }
 0x1c3   : > { %v1185_v0 = vpop.f32.mrb[4].mxu0 }
 0x1c4   : > { %v4917_v1 = vadd.f32 %v1185_v0, %v634_v45  ;;  %v1187_v2 = vpop.f32.mrb[5].mxu0 }
 0x1c5   : > { %v4919_v4 = vadd.f32 %v1187_v2, %v638_v49  ;;  %v1189_v5 = vpop.f32.mrb[6].mxu0 }
 0x1c6   : > { %v4921_v6 = vadd.f32 %v1189_v5, %v634_v45  ;;  %v1191_v7 = vpop.f32.mrb[7].mxu0 }
 0x1c7   : > { %v4923_v8 = vadd.f32 %v1191_v7, %v638_v49  ;;  %v653_v49 = vsub.s32 5, %v4894_v35 }
 0x1c8   : > { %v1306_v9 = vpack.c.bf16 %v4921_v6, %v4917_v1 }
 0x1c9   : > { %v1307_v10 = vpack.c.bf16 %v4923_v8, %v4919_v4  ;;  %v4963_v53 = vrot.slane %v4902_v40, %v653_v49  ;;  %v4046_v4 = vld [vmem:[#allocation8 + $0x44] ss:$8 sps:$4 sm:$0xff]   ;;  %v4044_v8 = vld [vmem:[#allocation8 + $0x40] ss:$8 sps:$4 sm:$0xff]  }
 0x1fb   : > { %v1228_v16 = vpop.f32.mrb[8].mxu0 }
 0x1fc   : > { %v1230_v18 = vpop.f32.mrb[9].mxu0  ;;  %v1229_v41 = vadd.f32 %v1228_v16, %v642_v14 }
 0x1fd   : > { %v1232_v19 = vpop.f32.mrb[10].mxu0  ;;  %v1231_v15 = vadd.f32 %v1230_v18, %v646_v17 }
 0x1fe   : > { %v1233_v20 = vadd.f32 %v1232_v19, %v642_v14  ;;  %v1234_v43 = vpop.f32.mrb[11].mxu0 }
 0x1ff   : > { %v1235_v50 = vadd.f32 %v1234_v43, %v646_v17 }
 0x200   : > { %v1302_v21 = vpack.c.bf16 %v1233_v20, %v1229_v41 }
 0x201   : > { %v1303_v22 = vpack.c.bf16 %v1235_v50, %v1231_v15 }
 0x202   : > { %3728 = vmatpush3.bf16.xpose.msra.mxu1 %v1302_v21 }
 0x203   : > { %3733 = vmatprep.subr.bf16.mxu1 %v4557_v12  ;;  %v1238_v23 = vpop.f32.mrb[12].mxu0 }
 0x204   : > { %v4943_v24 = vadd.f32 %v1238_v23, %v642_v14  ;;  %v1240_v25 = vpop.f32.mrb[13].mxu0 }
 0x205   : > { %v4945_v26 = vadd.f32 %v1240_v25, %v646_v17  ;;  %v1242_v27 = vpop.f32.mrb[14].mxu0 }
 0x206   : > { %v4947_v28 = vadd.f32 %v1242_v27, %v642_v14  ;;  %v1244_v29 = vpop.f32.mrb[15].mxu0 }
 0x207   : > { %v4949_v30 = vadd.f32 %v1244_v29, %v646_v17 }
 0x208   : > { %v1308_v31 = vpack.c.bf16 %v4947_v28, %v4943_v24 }
 0x209   : > { %3730 = vmatmul.mubr.bf16.vlgmr.msra.gmra.mrb[0].mxu1 %v1300_v60  ;;  %v1309_v32 = vpack.c.bf16 %v4949_v30, %v4945_v26  ;;  %v4035_v26 = vld [vmem:[#allocation8 + $0x10] ss:$8 sps:$4 sm:$0xff]   ;;  %v4040_v30 = vld [vmem:[#allocation8 + $0x24] ss:$8 sps:$4 sm:$0xff]  }
 0x20a   : > { %3735 = vmatprep.mubr.msk.bf16.mxu1 %vm4558_vm0, %v4557_v12 }
 0x23b   : > { %v1281_v48 = vpop.f32.mrb[16].mxu0 }
 0x23c   : > { %v1283_v51 = vpop.f32.mrb[17].mxu0  ;;  %v1282_v56 = vadd.f32 %v1281_v48, %v4960_v52 }
 0x23d   : > { %v1285_v54 = vpop.f32.mrb[18].mxu0  ;;  %v1284_v57 = vadd.f32 %v1283_v51, %v4963_v53 }
 0x23e   : > { %v1287_v55 = vpop.f32.mrb[19].mxu0  ;;  %v1286_v60 = vadd.f32 %v1285_v54, %v4960_v52 }
 0x23f   : > { %v1288_v61 = vadd.f32 %v1287_v55, %v4963_v53 }
 0x240   : > { %v1304_v63 = vpack.c.bf16 %v1286_v60, %v1282_v56 }
 0x241   : > { %v1305_v0 = vpack.c.bf16 %v1288_v61, %v1284_v57 }
 0x242   : > { %3734 = vmatpush3.bf16.msra.mxu1 %v1304_v63 }
 0x243   : > { %3739 = vmatprep.subr.bf16.mxu1 %v4557_v12  ;;  %v1291_v6 = vpop.f32.mrb[20].mxu0 }
 0x244   : > { %v1292_v56 = vadd.f32 %v1291_v6, %v4960_v52 }
 0x2dc   : > { %v1346_v33 = vpop.f32.mrb[0].mxu1 }
 0x2dd   : > { %v1353_v34 = vmul.f32 0.088388346, %v1346_v33  ;;  %v3731_v36 = vpop.f32.mrb[1].mxu1 }
 0x2de   : > { %v1349_v37 = vpop.f32.mrb[2].mxu1 }
 0x2df   : > { %v1354_v39 = vmul.f32 0.088388346, %v1349_v37  ;;  %v3732_v42 = vpop.f32.mrb[3].mxu1  ;;  %v1356_v45 = vsel %vm1355_vm1, %v1353_v34, -inf }
 0x2e0   : > { %1357 = vmax.xlane.f32.xlu0 %v1356_v45 }
 0x2e1   : > { %v1359_v46 = vsel %vm1355_vm1, %v1354_v39, -inf }
 0x2e4   : > { %1360 = vmax.xlane.f32.xlu0 %v1359_v46 }
 0x36d   : > { %v1358_v2 = vpop.xlane.xlu0 %1357 }
 0x36e   : > { %v1362_v3 = vsub.f32 %v1353_v34, %v1358_v2 }
 0x370   : > { %v1364_v5 = vmul.f32 1.442695, %v1362_v3 }
 0x371   : > { %v1361_v40 = vpop.xlane.xlu0 %1360 }
 0x372   : > { %v1363_v7 = vsub.f32 %v1354_v39, %v1361_v40  ;;  %4272 = vpow2.f32 %v1364_v5 }
 0x374   : > { %v1366_v14 = vmul.f32 1.442695, %v1363_v7 }
 0x376   : > { %4274 = vpow2.f32 %v1366_v14 }
 0x37c   : > { %v4970_v16 = vpop.eup %4272 }
 0x380   : > { %v4972_v17 = vpop.eup %4274 }
 0x381   : > { %v1374_v18 = vpack.c.bf16 %v4972_v17, %v4970_v16 }
 0x383   : > { %3736 = vmatmul.mubr.msk.bf16.vlgmr.msra.gmra.mrb[4].mxu1 %vm1355_vm1, %v1374_v18 }
 0x384   : > { %3740 = vmatpush3.bf16.xpose.msra.mxu1 %v1303_v22  ;;  %3741 = vmatprep.mubr.msk.bf16.mxu1 %vm4558_vm0, %v4557_v12 }
 0x385   : > { %3745 = vmatprep.subr.bf16.mxu1 %v4557_v12 }
 0x38b   : > { %3742 = vmatmul.mubr.bf16.vlgmr.msra.gmra.mrb[8].mxu1 %v1301_v62 }
 0x38c   : > { %3746 = vmatpush3.bf16.msra.mxu1 %v1305_v0  ;;  %3747 = vmatprep.mubr.msk.bf16.mxu1 %vm4558_vm0, %v4557_v12 }
 0x38d   : > { %3751 = vmatprep.subr.bf16.mxu1 %v4557_v12 }
 0x456   : > { %v4986_v19 = vpop.f32.mrb[4].mxu1 }
 0x457   : > { %v3737_v41 = vpop.f32.mrb[5].mxu1 }
 0x458   : > { %v4988_v20 = vpop.f32.mrb[6].mxu1 }
 0x459   : > { %v3738_v43 = vpop.f32.mrb[7].mxu1 }
 0x45e   : > { %v1459_v15 = vpop.f32.mrb[8].mxu1 }
 0x45f   : > { %v1466_v50 = vmul.f32 0.088388346, %v1459_v15  ;;  %v3743_v21 = vpop.f32.mrb[9].mxu1 }
 0x460   : > { %v1462_v22 = vpop.f32.mrb[10].mxu1  ;;  %v4037_v21 = vld [vmem:[#allocation8 + $0x14] ss:$8 sps:$4 sm:$0xff]  }
 0x461   : > { %v1467_v23 = vmul.f32 0.088388346, %v1462_v22  ;;  %v3744_v25 = vpop.f32.mrb[11].mxu1  ;;  %v1468_v58 = vsel %vm1355_vm1, %v1466_v50, -inf  ;;  %v4043_v22 = vld [vmem:[#allocation8 + $0x34] ss:$8 sps:$4 sm:$0xff]  }
 0x462   : > { %1469 = vmax.xlane.f32.xlu1 %v1468_v58  ;;  %v4052_v25 = vld [vmem:[#allocation8 + $0x64] ss:$8 sps:$4 sm:$0xff]   ;;  %v4050_v58 = vld [vmem:[#allocation8 + $0x60] ss:$8 sps:$4 sm:$0xff]  }
 0x463   : > { %v1471_v59 = vsel %vm1355_vm1, %v1467_v23, -inf }
 0x466   : > { %1472 = vmax.xlane.f32.xlu1 %v1471_v59  ;;  %v4055_v59 = vld [vmem:[#allocation8 + $0x74] ss:$8 sps:$4 sm:$0xff]  }
 0x4ef   : > { %v1470_v62 = vpop.xlane.xlu1 %1469 }
 0x4f0   : > { %v1474_v27 = vsub.f32 %v1466_v50, %v1470_v62  ;;  %v4034_v50 = vld [vmem:[#allocation8 + $0x4] ss:$8 sps:$4 sm:$0xff]   ;;  %v4053_v62 = vld [vmem:[#allocation8 + $0x70] ss:$8 sps:$4 sm:$0xff]  }
 0x4f1   : > { %1969 = vmatprep.subr.bf16.mxu0 %v4034_v50 }
 0x4f2   : > { %v1476_v29 = vmul.f32 1.442695, %v1474_v27  ;;  %v4058_v27 = vld [vmem:[#allocation8 + $0x84] ss:$8 sps:$4 sm:$0xff]  }
 0x4f3   : > { %v1473_v33 = vpop.xlane.xlu1 %1472 }
 0x4f4   : > { %v1475_v34 = vsub.f32 %v1467_v23, %v1473_v33  ;;  %4276 = vpow2.f32 %v1476_v29  ;;  %v4041_v23 = vld [vmem:[#allocation8 + $0x30] ss:$8 sps:$4 sm:$0xff]   ;;  %v4056_v29 = vld [vmem:[#allocation8 + $0x80] ss:$8 sps:$4 sm:$0xff]   ;;  %v4061_v33 = vld [vmem:[#allocation8 + $0x94] ss:$8 sps:$4 sm:$0xff]  }
 0x4f6   : > { %v1478_v36 = vmul.f32 1.442695, %v1475_v34  ;;  %v4059_v34 = vld [vmem:[#allocation8 + $0x90] ss:$8 sps:$4 sm:$0xff]  }
 0x4f8   : > { %4278 = vpow2.f32 %v1478_v36 }
 0x4fe   : > { %v4992_v37 = vpop.eup %4276 }
 0x4ff   : > { %v1480_v6 = vsel %vm1355_vm1, %v4992_v37, 0.0 }
 0x502   : > { %v4994_v39 = vpop.eup %4278 }
 0x503   : > { %v1486_v42 = vpack.c.bf16 %v4994_v39, %v4992_v37  ;;  %v4070_v37 = vld [vmem:[#allocation8 + $0xc4] ss:$8 sps:$4 sm:$0xff]  }
 0x505   : > { %3748 = vmatmul.mubr.msk.bf16.vlgmr.msra.gmra.mrb[12].mxu1 %vm1355_vm1, %v1486_v42 }
 0x506   : > { %3752 = vmatpush3.bf16.xpose.msra.mxu1 %v1308_v31  ;;  %3753 = vmatprep.mubr.msk.bf16.mxu1 %vm4558_vm0, %v4557_v12 }
 0x507   : > { %3757 = vmatprep.subr.bf16.mxu1 %v4557_v12 }
 0x50d   : > { %3754 = vmatmul.mubr.bf16.vlgmr.msra.gmra.mrb[16].mxu1 %v1306_v9  ;;  %v1293_v9 = vpop.f32.mrb[21].mxu0 }
 0x50e   : > { %3759 = vmatprep.mubr.msk.bf16.mxu1 %vm4558_vm0, %v4557_v12  ;;  %v1294_v57 = vadd.f32 %v1293_v9, %v4963_v53  ;;  %v1295_v60 = vpop.f32.mrb[22].mxu0  ;;  %v1483_v9 = vsel %vm1355_vm1, %v4994_v39, 0.0  ;;  %v4073_v39 = vld [vmem:[#allocation8 + $0xd4] ss:$8 sps:$4 sm:$0xff]  }
 0x50f   : > { %v1297_v61 = vpop.f32.mrb[23].mxu0  ;;  %v1296_v63 = vadd.f32 %v1295_v60, %v4960_v52  ;;  %v4064_v60 = vld [vmem:[#allocation8 + $0xa4] ss:$8 sps:$4 sm:$0xff]  }
 0x510   : > { %v1298_v0 = vadd.f32 %v1297_v61, %v4963_v53  ;;  %v4032_v53 = vld [vmem:[#allocation8] ss:$8 sps:$4 sm:$0xff]  }
 0x511   : > { %v1310_v2 = vpack.c.bf16 %v1296_v63, %v1292_v56  ;;  %1970 = vmatpush1.bf16.msra.mxu0 %v4032_v53  ;;  %v1368_v56 = vsel %vm1355_vm1, %v4970_v16, 0.0  ;;  %v4062_v61 = vld [vmem:[#allocation8 + $0xa0] ss:$8 sps:$4 sm:$0xff]   ;;  %v4067_v63 = vld [vmem:[#allocation8 + $0xb4] ss:$8 sps:$4 sm:$0xff]  }
 0x512   : > { %v1311_v3 = vpack.c.bf16 %v1298_v0, %v1294_v57  ;;  %1971 = vmatprep.subr.bf16.mxu0 %v4037_v21  ;;  %v1371_v57 = vsel %vm1355_vm1, %v4972_v17, 0.0  ;;  %v4065_v0 = vld [vmem:[#allocation8 + $0xb0] ss:$8 sps:$4 sm:$0xff]   ;;  %v4076_v16 = vld [vmem:[#allocation8 + $0xe4] ss:$8 sps:$4 sm:$0xff]  }
 0x513   : > { %3758 = vmatpush3.bf16.msra.mxu1 %v1310_v2  ;;  %v4068_v2 = vld [vmem:[#allocation8 + $0xc0] ss:$8 sps:$4 sm:$0xff]   ;;  %v4079_v17 = vld [vmem:[#allocation8 + $0xf4] ss:$8 sps:$4 sm:$0xff]  }
 0x514   : > { %3763 = vmatprep.subr.bf16.mxu1 %v4557_v12 }
 0x515   : > { %1972 = vmatpush1.bf16.msra.mxu0 %v4035_v26 }
 0x516   : > { %1973 = vmatprep.subr.bf16.mxu0 %v4040_v30 }
 0x5d8   : > { %v5010_v45 = vpop.f32.mrb[12].mxu1 }
 0x5d9   : > { %v3749_v46 = vpop.f32.mrb[13].mxu1 }
 0x5da   : > { %v5012_v47 = vpop.f32.mrb[14].mxu1 }
 0x5db   : > { %v3750_v48 = vpop.f32.mrb[15].mxu1 }
 0x5e0   : > { %v1571_v24 = vpop.f32.mrb[16].mxu1 }
 0x5e1   : > { %v1578_v28 = vmul.f32 0.088388346, %v1571_v24  ;;  %v3755_v31 = vpop.f32.mrb[17].mxu1 }
 0x5e2   : > { %v1574_v49 = vpop.f32.mrb[18].mxu1 }
 0x5e3   : > { %v1579_v51 = vmul.f32 0.088388346, %v1574_v49  ;;  %v3756_v54 = vpop.f32.mrb[19].mxu1  ;;  %v1580_v55 = vsel %vm1355_vm1, %v1578_v28, -inf }
 0x5e4   : > { %1581 = vmax.xlane.f32.xlu0 %v1580_v55 }
 0x5e5   : > { %v1583_v1 = vsel %vm1355_vm1, %v1579_v51, -inf }
 0x5e6   : > { %1584 = vmax.xlane.f32.xlu1 %v1583_v1 }
 0x671   : > { %v1582_v5 = vpop.xlane.xlu0 %1581 }
 0x672   : > { %v1586_v40 = vsub.f32 %v1578_v28, %v1582_v5  ;;  %v4074_v5 = vld [vmem:[#allocation8 + $0xe0] ss:$8 sps:$4 sm:$0xff]  }
 0x673   : > { %v1585_v7 = vpop.xlane.xlu1 %1584 }
 0x674   : > { %v1588_v14 = vmul.f32 1.442695, %v1586_v40  ;;  %v1587_v18 = vsub.f32 %v1579_v51, %v1585_v7  ;;  %v4077_v40 = vld [vmem:[#allocation8 + $0xf0] ss:$8 sps:$4 sm:$0xff]  }
 0x676   : > { %v1590_v41 = vmul.f32 1.442695, %v1587_v18  ;;  %4280 = vpow2.f32 %v1588_v14 }
 0x678   : > { %4282 = vpow2.f32 %v1590_v41 }
 0x680   : > { %v5021_v43 = vpop.eup %4280 }
 0x682   : > { %v5023_v15 = vpop.eup %4282 }
 0x683   : > { %v1598_v52 = vpack.c.bf16 %v5023_v15, %v5021_v43 }
 0x685   : > { %3760 = vmatmul.mubr.msk.bf16.vlgmr.msra.gmra.mrb[20].mxu1 %vm1355_vm1, %v1598_v52 }
 0x686   : > { %3764 = vmatpush3.bf16.xpose.msra.mxu1 %v1309_v32  ;;  %3765 = vmatprep.mubr.msk.bf16.mxu1 %vm4558_vm0, %v4557_v12  ;;  %v4038_v32 = vld [vmem:[#allocation8 + $0x20] ss:$8 sps:$4 sm:$0xff]  }
 0x687   : > { %3769 = vmatprep.subr.bf16.mxu1 %v4557_v12  ;;  %1974 = vmatpush1.bf16.msra.mxu0 %v4038_v32 }
 0x688   : > { %1975 = vmatprep.subr.bf16.mxu0 %v4043_v22 }
 0x68b   : > { %1976 = vmatpush1.bf16.msra.mxu0 %v4041_v23 }
 0x68c   : > { %1977 = vmatprep.subr.bf16.mxu0 %v4046_v4 }
 0x68d   : > { %3766 = vmatmul.mubr.bf16.vlgmr.msra.gmra.mrb[24].mxu1 %v1307_v10  ;;  %v4047_v10 = vld [vmem:[#allocation8 + $0x50] ss:$8 sps:$4 sm:$0xff]  }
 0x68e   : > { %3770 = vmatpush3.bf16.msra.mxu1 %v1311_v3  ;;  %3771 = vmatprep.mubr.msk.bf16.mxu1 %vm4558_vm0, %v4557_v12  ;;  %v4049_v12 = vld [vmem:[#allocation8 + $0x54] ss:$8 sps:$4 sm:$0xff]   ;;  %v4071_v3 = vld [vmem:[#allocation8 + $0xd0] ss:$8 sps:$4 sm:$0xff]  }
 0x68f   : > { %1978 = vmatpush1.bf16.msra.mxu0 %v4044_v8 }
 0x690   : > { %1979 = vmatprep.subr.bf16.mxu0 %v4049_v12 }
 0x693   : > { %1980 = vmatpush1.bf16.msra.mxu0 %v4047_v10 }
 0x694   : > { %1981 = vmatprep.subr.bf16.mxu0 %v4052_v25 }
 0x697   : > { %1982 = vmatpush1.bf16.msra.mxu0 %v4050_v58 }
 0x698   : > { %1983 = vmatprep.subr.bf16.mxu0 %v4055_v59 }
 0x69b   : > { %1984 = vmatpush1.bf16.msra.mxu0 %v4053_v62  ;;  %v1592_v62 = vsel %vm1355_vm1, %v5021_v43, 0.0 }
 0x69c   : > { %1985 = vmatprep.subr.bf16.mxu0 %v4058_v27 }
 0x69f   : > { %1986 = vmatpush1.bf16.msra.mxu0 %v4056_v29 }
 0x6a0   : > { %1987 = vmatprep.subr.bf16.mxu0 %v4061_v33 }
 0x6a3   : > { %1988 = vmatpush1.bf16.msra.mxu0 %v4059_v34 }
 0x6a4   : > { %1989 = vmatprep.subr.bf16.mxu0 %v4064_v60 }
 0x6a7   : > { %1990 = vmatpush1.bf16.msra.mxu0 %v4062_v61 }
 0x6a8   : > { %1991 = vmatprep.subr.bf16.mxu0 %v4067_v63 }
 0x6ab   : > { %1992 = vmatpush1.bf16.msra.mxu0 %v4065_v0 }
 0x6ac   : > { %1993 = vmatprep.subr.bf16.mxu0 %v4070_v37 }
 0x6af   : > { %1994 = vmatpush1.bf16.msra.mxu0 %v4068_v2 }
 0x6b0   : > { %1995 = vmatprep.subr.bf16.mxu0 %v4073_v39  ;;  %v4320_v39 = vld [vmem:[%s4852_s25] sm:$0xff] }
 0x6b3   : > { %1996 = vmatpush1.bf16.msra.mxu0 %v4071_v3 }
 0x6b4   : > { %1997 = vmatprep.subr.bf16.mxu0 %v4076_v16 }
 0x6b7   : > { %1998 = vmatpush1.bf16.msra.mxu0 %v4074_v5 }
 0x6b8   : > { %1999 = vmatprep.subr.bf16.mxu0 %v4079_v17  ;;  %v4321_v17 = vld [vmem:[%s4852_s25 + $0x8] sm:$0xff] }
 0x6bb   : > { %2000 = vmatpush1.bf16.msra.mxu0 %v4077_v40 }
 0x758   : > { %v5039_v36 = vpop.f32.mrb[20].mxu1 }
 0x759   : > { %v3761_v42 = vpop.f32.mrb[21].mxu1 }
 0x75a   : > { %v5041_v46 = vpop.f32.mrb[22].mxu1  ;;  %v1595_v42 = vsel %vm1355_vm1, %v5023_v15, 0.0 }
 0x75b   : > { %v3762_v48 = vpop.f32.mrb[23].mxu1 }
 0x760   : > { %v1683_v24 = vpop.f32.mrb[24].mxu1 }
 0x761   : > { %v1690_v28 = vmul.f32 0.088388346, %v1683_v24  ;;  %v3767_v31 = vpop.f32.mrb[25].mxu1 }
 0x762   : > { %v1686_v49 = vpop.f32.mrb[26].mxu1 }
 0x763   : > { %v1691_v51 = vmul.f32 0.088388346, %v1686_v49  ;;  %v3768_v54 = vpop.f32.mrb[27].mxu1  ;;  %v1692_v55 = vsel %vm1355_vm1, %v1690_v28, -inf }
 0x764   : > { %1693 = vmax.xlane.f32.xlu0 %v1692_v55 }
 0x765   : > { %v1695_v1 = vsel %vm1355_vm1, %v1691_v51, -inf }
 0x766   : > { %1696 = vmax.xlane.f32.xlu1 %v1695_v1 }
 0x768   : > { %1481 = vadd.xlane.f32.xlu0 %v1480_v6 }
 0x76a   : > { %1484 = vadd.xlane.f32.xlu1 %v1483_v9 }
 0x76c   : > { %1369 = vadd.xlane.f32.xlu0 %v1368_v56 }
 0x76e   : > { %1372 = vadd.xlane.f32.xlu1 %v1371_v57 }
 0x7f1   : > { %v1694_v7 = vpop.xlane.xlu0 %1693 }
 0x7f2   : > { %v1698_v14 = vsub.f32 %v1690_v28, %v1694_v7 }
 0x7f3   : > { %v1697_v18 = vpop.xlane.xlu1 %1696 }
 0x7f4   : > { %v1700_v41 = vmul.f32 1.442695, %v1698_v14  ;;  %v1699_v52 = vsub.f32 %v1691_v51, %v1697_v18  ;;  %v1797_v51 = vld [vmem:[%s5339_s4] sm:$0x3]  ;;  %v4322_v14 = vld [vmem:[%s4852_s25 + $0x10] sm:$0xff] }
 0x7f5   : > { %v1482_v53 = vpop.xlane.xlu0 %1481 }
 0x7f6   : > { %4284 = vpow2.f32 %v1700_v41  ;;  %v1702_v50 = vmul.f32 1.442695, %v1699_v52  ;;  %v4323_v41 = vld [vmem:[%s4852_s25 + $0x18] sm:$0xff] }
 0x7f7   : > { %4286 = vrcp.f32 %v1482_v53  ;;  %v1485_v21 = vpop.xlane.xlu1 %1484 }
 0x7f8   : > { %4288 = vpow2.f32 %v1702_v50 }
 0x7f9   : > { %4290 = vrcp.f32 %v1485_v21  ;;  %v1370_v26 = vpop.xlane.xlu0 %1369  ;;  %v4080_v21 = vld [vmem:[#allocation9] ss:$16 sps:$4 sm:$0xff]  }
 0x7fa   : > { %4292 = vrcp.f32 %v1370_v26  ;;  %v4082_v26 = vld [vmem:[#allocation9 + $0x4] ss:$16 sps:$4 sm:$0xff]  }
 0x7fb   : > { %v1373_v30 = vpop.xlane.xlu1 %1372  ;;  %2545 = vmatprep.subr.bf16.mxu1 %v4082_v26  ;;  %v4326_v26 = vld [vmem:[%s4852_s25 + $0x30] sm:$0xff] }
 0x7fc   : > { %4294 = vrcp.f32 %v1373_v30  ;;  %v4083_v30 = vld [vmem:[#allocation9 + $0x8] ss:$16 sps:$4 sm:$0xff]  }
 0x800   : > { %v4285_v32 = vpop.eup %4284 }
 0x801   : > { %v4287_v22 = vpop.eup %4286  ;;  %v1704_v23 = vsel %vm1355_vm1, %v4285_v32, 0.0 }
 0x802   : > { %v4289_v4 = vpop.eup %4288  ;;  %1705 = vadd.xlane.f32.xlu0 %v1704_v23  ;;  %v1533_v58 = vmul.f32 %v4287_v22, %v5010_v45  ;;  %v4088_v22 = vld [vmem:[#allocation9 + $0x24] ss:$16 sps:$4 sm:$0xff]   ;;  %v4091_v23 = vld [vmem:[#allocation9 + $0x2c] ss:$16 sps:$4 sm:$0xff]  }
 0x803   : > { %v4291_v8 = vpop.eup %4290  ;;  %v1707_v12 = vsel %vm1355_vm1, %v4289_v4, 0.0  ;;  %v1710_v10 = vpack.c.bf16 %v4289_v4, %v4285_v32  ;;  %v4085_v32 = vld [vmem:[#allocation9 + $0xc] ss:$16 sps:$4 sm:$0xff]   ;;  %v4086_v4 = vld [vmem:[#allocation9 + $0x20] ss:$16 sps:$4 sm:$0xff]  }
 0x804   : > { %v4293_v25 = vpop.eup %4292  ;;  %1708 = vadd.xlane.f32.xlu1 %v1707_v12  ;;  %v1534_v59 = vmul.f32 %v4291_v8, %v5012_v47  ;;  %2598 = vmatprep.subr.bf16.mxu0 %v4085_v32  ;;  %v4089_v8 = vld [vmem:[#allocation9 + $0x28] ss:$16 sps:$4 sm:$0xff]   ;;  %v4094_v12 = vld [vmem:[#allocation9 + $0x44] ss:$16 sps:$4 sm:$0xff]  }
 0x805   : > { %3772 = vmatmul.mubr.msk.bf16.vlgmr.msra.gmra.mrb[28].mxu1 %vm1355_vm1, %v1710_v10  ;;  %v1421_v33 = vmul.f32 %v4293_v25, %v4986_v19  ;;  %v4097_v10 = vld [vmem:[#allocation9 + $0x4c] ss:$16 sps:$4 sm:$0xff]   ;;  %v4092_v25 = vld [vmem:[#allocation9 + $0x40] ss:$16 sps:$4 sm:$0xff]  }
 0x806   : > { %v4295_v27 = vpop.eup %4294  ;;  %1593 = vadd.xlane.f32.xlu0 %v1592_v62  ;;  %v1535_v29 = vpack.c.bf16 %v1534_v59, %v1533_v58  ;;  %2546 = vmatpush1.bf16.msra.mxu1 %v4080_v21  ;;  %v4095_v58 = vld [vmem:[#allocation9 + $0x48] ss:$16 sps:$4 sm:$0xff]   ;;  %v4100_v59 = vld [vmem:[#allocation9 + $0x64] ss:$16 sps:$4 sm:$0xff]   ;;  %v4103_v62 = vld [vmem:[#allocation9 + $0x6c] ss:$16 sps:$4 sm:$0xff]  }
 0x807   : > { %v1422_v34 = vmul.f32 %v4295_v27, %v4988_v20  ;;  %2547 = vmatprep.subr.bf16.mxu1 %v4088_v22  ;;  %v4098_v27 = vld [vmem:[#allocation9 + $0x60] ss:$16 sps:$4 sm:$0xff]   ;;  %v4327_v32 = vld [vmem:[%s4852_s25 + $0x38] sm:$0xff] }
 0x808   : > { %2001 = vmatprep.mubr.bf16.mxu0 %v1535_v29  ;;  %1596 = vadd.xlane.f32.xlu1 %v1595_v42  ;;  %v4101_v29 = vld [vmem:[#allocation9 + $0x68] ss:$16 sps:$4 sm:$0xff]   ;;  %v4104_v42 = vld [vmem:[#allocation9 + $0x80] ss:$16 sps:$4 sm:$0xff]  }
 0x809   : > { %v1423_v45 = vpack.c.bf16 %v1422_v34, %v1421_v33  ;;  %v4106_v33 = vld [vmem:[#allocation9 + $0x84] ss:$16 sps:$4 sm:$0xff]   ;;  %v4109_v34 = vld [vmem:[#allocation9 + $0x8c] ss:$16 sps:$4 sm:$0xff]  }
 0x80a   : > { %2548 = vmatpush1.bf16.msra.mxu1 %v4086_v4 }
 0x80b   : > { %2002 = vmatmul.mubr.bf16.vlgmr.msra.gmra.mrb[24].mxu0 %v1423_v45  ;;  %2549 = vmatprep.subr.bf16.mxu1 %v4094_v12  ;;  %v4107_v45 = vld [vmem:[#allocation9 + $0x88] ss:$16 sps:$4 sm:$0xff]  }
 0x80c   : > { %2599 = vmatpush1.bf16.msra.mxu0 %v4083_v30 }
 0x80d   : > { %2600 = vmatprep.subr.bf16.mxu0 %v4091_v23 }
 0x80e   : > { %2550 = vmatpush1.bf16.msra.mxu1 %v4092_v25  ;;  %v4139_v25 = vld [vmem:[#allocation9 + $0x12c] ss:$16 sps:$4 sm:$0xff]  }
 0x80f   : > { %2551 = vmatprep.subr.bf16.mxu1 %v4100_v59  ;;  %v4137_v59 = vld [vmem:[#allocation9 + $0x128] ss:$16 sps:$4 sm:$0xff]  }
 0x810   : > { %2601 = vmatpush1.bf16.msra.mxu0 %v4089_v8 }
 0x811   : > { %2602 = vmatprep.subr.bf16.mxu0 %v4097_v10  ;;  %v4136_v10 = vld [vmem:[#allocation9 + $0x124] ss:$16 sps:$4 sm:$0xff]  }
 0x812   : > { %2552 = vmatpush1.bf16.msra.mxu1 %v4098_v27  ;;  %v4145_v27 = vld [vmem:[#allocation9 + $0x14c] ss:$16 sps:$4 sm:$0xff]  }
 0x813   : > { %2553 = vmatprep.subr.bf16.mxu1 %v4106_v33  ;;  %v4143_v33 = vld [vmem:[#allocation9 + $0x148] ss:$16 sps:$4 sm:$0xff]  }
 0x814   : > { %2603 = vmatpush1.bf16.msra.mxu0 %v4095_v58  ;;  %v4134_v58 = vld [vmem:[#allocation9 + $0x120] ss:$16 sps:$4 sm:$0xff]  }
 0x815   : > { %2604 = vmatprep.subr.bf16.mxu0 %v4103_v62  ;;  %v4142_v62 = vld [vmem:[#allocation9 + $0x144] ss:$16 sps:$4 sm:$0xff]  }
 0x816   : > { %2554 = vmatpush1.bf16.msra.mxu1 %v4104_v42  ;;  %v4151_v42 = vld [vmem:[#allocation9 + $0x16c] ss:$16 sps:$4 sm:$0xff]  }
 0x818   : > { %2605 = vmatpush1.bf16.msra.mxu0 %v4101_v29  ;;  %v4140_v29 = vld [vmem:[#allocation9 + $0x140] ss:$16 sps:$4 sm:$0xff]  }
 0x819   : > { %2606 = vmatprep.subr.bf16.mxu0 %v4109_v34  ;;  %v4148_v34 = vld [vmem:[#allocation9 + $0x164] ss:$16 sps:$4 sm:$0xff]  }
 0x81c   : > { %2607 = vmatpush1.bf16.msra.mxu0 %v4107_v45  ;;  %v4146_v45 = vld [vmem:[#allocation9 + $0x160] ss:$16 sps:$4 sm:$0xff]  }
 0x88f   : > { %v1706_v47 = vpop.xlane.xlu0 %1705 }
 0x891   : > { %v1709_v48 = vpop.xlane.xlu1 %1708 }
 0x893   : > { %v1594_v24 = vpop.xlane.xlu0 %1593 }
 0x894   : > { %4296 = vrcp.f32 %v1594_v24  ;;  %v4110_v24 = vld [vmem:[#allocation9 + $0xa0] ss:$16 sps:$4 sm:$0xff]  }
 0x895   : > { %v1597_v28 = vpop.xlane.xlu1 %1596 }
 0x896   : > { %4298 = vrcp.f32 %v1597_v28  ;;  %v4113_v28 = vld [vmem:[#allocation9 + $0xa8] ss:$16 sps:$4 sm:$0xff]  }
 0x897   : > { %4300 = vrcp.f32 %v1706_v47  ;;  %v4112_v47 = vld [vmem:[#allocation9 + $0xa4] ss:$16 sps:$4 sm:$0xff]  }
 0x898   : > { %4302 = vrcp.f32 %v1709_v48  ;;  %v4115_v48 = vld [vmem:[#allocation9 + $0xac] ss:$16 sps:$4 sm:$0xff]   ;;  %2555 = vmatprep.subr.bf16.mxu1 %v4112_v47  ;;  %v4149_v47 = vld [vmem:[#allocation9 + $0x168] ss:$16 sps:$4 sm:$0xff]  }
 0x899   : > { %2608 = vmatprep.subr.bf16.mxu0 %v4115_v48  ;;  %2556 = vmatpush1.bf16.msra.mxu1 %v4110_v24  ;;  %v4154_v48 = vld [vmem:[#allocation9 + $0x184] ss:$16 sps:$4 sm:$0xff]   ;;  %v4157_v24 = vld [vmem:[#allocation9 + $0x18c] ss:$16 sps:$4 sm:$0xff]  }
 0x89a   : > { %2609 = vmatpush1.bf16.msra.mxu0 %v4113_v28  ;;  %v4152_v28 = vld [vmem:[#allocation9 + $0x180] ss:$16 sps:$4 sm:$0xff]  }
 0x89e   : > { %v4297_v43 = vpop.eup %4296 }
 0x89f   : > { %v1645_v49 = vmul.f32 %v4297_v43, %v5039_v36  ;;  %v5070_v36 = vrot.slane %v1797_v51, %v4897_v38  ;;  %v4118_v43 = vld [vmem:[#allocation9 + $0xc4] ss:$16 sps:$4 sm:$0xff]  }
 0x8a0   : > { %v4299_v31 = vpop.eup %4298  ;;  %2557 = vmatprep.subr.bf16.mxu1 %v4118_v43  ;;  %v4155_v43 = vld [vmem:[#allocation9 + $0x188] ss:$16 sps:$4 sm:$0xff]  }
 0x8a1   : > { %v1646_v19 = vmul.f32 %v4299_v31, %v5041_v46  ;;  %v4301_v54 = vpop.eup %4300  ;;  %v5073_v46 = vrot.slane %v1797_v51, %v4905_v44  ;;  %v4121_v31 = vld [vmem:[#allocation9 + $0xcc] ss:$16 sps:$4 sm:$0xff]   ;;  %v4122_v51 = vld [vmem:[#allocation9 + $0xe0] ss:$16 sps:$4 sm:$0xff]  }
 0x8a2   : > { %v4303_v1 = vpop.eup %4302  ;;  %2610 = vmatprep.subr.bf16.mxu0 %v4121_v31  ;;  %v4160_v31 = vld [vmem:[#allocation9 + $0x1a4] ss:$16 sps:$4 sm:$0xff]  }
 0x8a3   : > { %v1647_v20 = vpack.c.bf16 %v1646_v19, %v1645_v49  ;;  %v4116_v49 = vld [vmem:[#allocation9 + $0xc0] ss:$16 sps:$4 sm:$0xff]   ;;  %v4119_v19 = vld [vmem:[#allocation9 + $0xc8] ss:$16 sps:$4 sm:$0xff]  }
 0x8a4   : > { %2558 = vmatpush1.bf16.msra.mxu1 %v4116_v49  ;;  %2611 = vmatpush1.bf16.msra.mxu0 %v4119_v19  ;;  %v4163_v49 = vld [vmem:[#allocation9 + $0x1ac] ss:$16 sps:$4 sm:$0xff]   ;;  %v4158_v19 = vld [vmem:[#allocation9 + $0x1a0] ss:$16 sps:$4 sm:$0xff]  }
 0x8d8   : > { %v1748_v15 = vpop.f32.mrb[28].mxu1 }
 0x8d9   : > { %v3773_v55 = vpop.f32.mrb[29].mxu1  ;;  %v1757_v9 = vmul.f32 %v4301_v54, %v1748_v15  ;;  %v4127_v15 = vld [vmem:[#allocation9 + $0xec] ss:$16 sps:$4 sm:$0xff]   ;;  %v4125_v54 = vld [vmem:[#allocation9 + $0xe8] ss:$16 sps:$4 sm:$0xff]  }
 0x8da   : > { %v1751_v6 = vpop.f32.mrb[30].mxu1  ;;  %v4130_v55 = vld [vmem:[#allocation9 + $0x104] ss:$16 sps:$4 sm:$0xff]   ;;  %2612 = vmatprep.subr.bf16.mxu0 %v4127_v15  ;;  %v4164_v15 = vld [vmem:[#allocation9 + $0x1c0] ss:$16 sps:$4 sm:$0xff]  }
 0x8db   : > { %v1758_v56 = vmul.f32 %v4303_v1, %v1751_v6  ;;  %v3774_v57 = vpop.f32.mrb[31].mxu1  ;;  %v4133_v1 = vld [vmem:[#allocation9 + $0x10c] ss:$16 sps:$4 sm:$0xff]   ;;  %v4128_v6 = vld [vmem:[#allocation9 + $0x100] ss:$16 sps:$4 sm:$0xff]   ;;  %2613 = vmatpush1.bf16.msra.mxu0 %v4125_v54 }
 0x8dc   : > { %2614 = vmatprep.subr.bf16.mxu0 %v4133_v1  ;;  %v4167_v54 = vld [vmem:[#allocation9 + $0x1c8] ss:$16 sps:$4 sm:$0xff]   ;;  %v4172_v1 = vld [vmem:[#allocation9 + $0x1e4] ss:$16 sps:$4 sm:$0xff]  }
 0x8dd   : > { %v1759_v60 = vpack.c.bf16 %v1758_v56, %v1757_v9  ;;  %v4131_v9 = vld [vmem:[#allocation9 + $0x108] ss:$16 sps:$4 sm:$0xff]  }
 0x8de   : > { %v2003_v61 = vpop.f32.mrb[24].mxu0 }
 0x8df   : > { %v2004_v63 = vadd.f32 %v2003_v61, %v5070_v36  ;;  %v2005_v0 = vpop.f32.mrb[25].mxu0  ;;  %2011 = vmatprep.mubr.bf16.mxu0 %v1759_v60  ;;  %2615 = vmatpush1.bf16.msra.mxu0 %v4131_v9  ;;  %v4170_v9 = vld [vmem:[#allocation9 + $0x1e0] ss:$16 sps:$4 sm:$0xff]  }
 0x8e0   : > { %v2006_v37 = vadd.f32 %v2005_v0, %v5073_v46  ;;  %v2007_v2 = vpop.f32.mrb[26].mxu0  ;;  %2012 = vmatmul.mubr.bf16.gmra.mrb[28].mxu0 %v1647_v20  ;;  %v4124_v20 = vld [vmem:[#allocation9 + $0xe4] ss:$16 sps:$4 sm:$0xff]   ;;  %2616 = vmatprep.subr.bf16.mxu0 %v4139_v25 }
 0x8e1   : > { %v5078_v3 = vadd.f32 %v4320_v39, %v2004_v63  ;;  %v2008_v16 = vadd.f32 %v2007_v2, %v5070_v36  ;;  %v2009_v5 = vpop.f32.mrb[27].mxu0  ;;  %2559 = vmatprep.subr.bf16.mxu1 %v4124_v20  ;;  %v4161_v20 = vld [vmem:[#allocation9 + $0x1a8] ss:$16 sps:$4 sm:$0xff]  }
 0x8e2   : > { %v5082_v40 = vadd.f32 %v4321_v17, %v2006_v37  ;;  %v2010_v7 = vadd.f32 %v2009_v5, %v5073_v46  ;;  %2560 = vmatpush1.bf16.msra.mxu1 %v4122_v51  ;;  %v4324_v17 = vld [vmem:[%s4852_s25 + $0x20] sm:$0xff] }
 0x8e3   : > { %v5086_v18 = vadd.f32 %v4322_v14, %v2008_v16  ;;  %2561 = vmatprep.subr.bf16.mxu1 %v4130_v55  ;;  %2617 = vmatpush1.bf16.msra.mxu0 %v4137_v59  ;;  %v4166_v51 = vld [vmem:[#allocation9 + $0x1c4] ss:$16 sps:$4 sm:$0xff]   ;;  %v4169_v55 = vld [vmem:[#allocation9 + $0x1cc] ss:$16 sps:$4 sm:$0xff]  }
 0x8e4   : > { %v5089_v52 = vadd.f32 %v4323_v41, %v2010_v7  ;;  %v2030_v53 = vadd.f32 %v5082_v40, %v5078_v3  ;;  %2618 = vmatprep.subr.bf16.mxu0 %v4145_v27 }
 0x8e6   : > { %2031 = vadd.xlane.f32.xlu0 %v2030_v53  ;;  %v2033_v50 = vadd.f32 %v5089_v52, %v5086_v18  ;;  %2562 = vmatpush1.bf16.msra.mxu1 %v4128_v6  ;;  %v4175_v6 = vld [vmem:[#allocation9 + $0x1ec] ss:$16 sps:$4 sm:$0xff]  }
 0x8e7   : > { %2563 = vmatprep.subr.bf16.mxu1 %v4136_v10  ;;  %2619 = vmatpush1.bf16.msra.mxu0 %v4143_v33 }
 0x8e8   : > { %2034 = vadd.xlane.f32.xlu1 %v2033_v50  ;;  %2620 = vmatprep.subr.bf16.mxu0 %v4151_v42 }
 0x8ea   : > { %2564 = vmatpush1.bf16.msra.mxu1 %v4134_v58 }
 0x8eb   : > { %2565 = vmatprep.subr.bf16.mxu1 %v4142_v62  ;;  %2621 = vmatpush1.bf16.msra.mxu0 %v4149_v47  ;;  %v4176_v47 = vld [vmem:[#allocation11] ss:$8 sps:$4 sm:$0xff]  }
 0x8ec   : > { %2622 = vmatprep.subr.bf16.mxu0 %v4157_v24  ;;  %v4181_v24 = vld [vmem:[#allocation11 + $0x14] ss:$8 sps:$4 sm:$0xff]  }
 0x8ee   : > { %2566 = vmatpush1.bf16.msra.mxu1 %v4140_v29 }
 0x8ef   : > { %2567 = vmatprep.subr.bf16.mxu1 %v4148_v34  ;;  %2623 = vmatpush1.bf16.msra.mxu0 %v4155_v43  ;;  %v4184_v43 = vld [vmem:[#allocation11 + $0x24] ss:$8 sps:$4 sm:$0xff]  }
 0x8f0   : > { %2624 = vmatprep.subr.bf16.mxu0 %v4163_v49  ;;  %v4187_v49 = vld [vmem:[#allocation11 + $0x34] ss:$8 sps:$4 sm:$0xff]  }
 0x8f2   : > { %2568 = vmatpush1.bf16.msra.mxu1 %v4146_v45 }
 0x8f3   : > { %2569 = vmatprep.subr.bf16.mxu1 %v4154_v48  ;;  %2625 = vmatpush1.bf16.msra.mxu0 %v4161_v20  ;;  %v4178_v48 = vld [vmem:[#allocation11 + $0x4] ss:$8 sps:$4 sm:$0xff]  }
 0x8f4   : > { %2626 = vmatprep.subr.bf16.mxu0 %v4169_v55  ;;  %v4190_v20 = vld [vmem:[#allocation11 + $0x44] ss:$8 sps:$4 sm:$0xff]  }
 0x8f5   : > { %v4196_v55 = vld [vmem:[#allocation11 + $0x64] ss:$8 sps:$4 sm:$0xff]  }
 0x8f6   : > { %2570 = vmatpush1.bf16.msra.mxu1 %v4152_v28  ;;  %v4179_v28 = vld [vmem:[#allocation11 + $0x10] ss:$8 sps:$4 sm:$0xff]  }
 0x8f7   : > { %2571 = vmatprep.subr.bf16.mxu1 %v4160_v31  ;;  %2627 = vmatpush1.bf16.msra.mxu0 %v4167_v54  ;;  %v4182_v31 = vld [vmem:[#allocation11 + $0x20] ss:$8 sps:$4 sm:$0xff]   ;;  %v4191_v54 = vld [vmem:[#allocation11 + $0x50] ss:$8 sps:$4 sm:$0xff]  }
 0x8f8   : > { %2628 = vmatprep.subr.bf16.mxu0 %v4175_v6  ;;  %v4199_v6 = vld [vmem:[#allocation11 + $0x74] ss:$8 sps:$4 sm:$0xff]  }
 0x8fa   : > { %2572 = vmatpush1.bf16.msra.mxu1 %v4158_v19  ;;  %v4185_v19 = vld [vmem:[#allocation11 + $0x30] ss:$8 sps:$4 sm:$0xff]  }
 0x8fb   : > { %2573 = vmatprep.subr.bf16.mxu1 %v4166_v51  ;;  %v4193_v51 = vld [vmem:[#allocation11 + $0x54] ss:$8 sps:$4 sm:$0xff]  }
 0x8fe   : > { %2574 = vmatpush1.bf16.msra.mxu1 %v4164_v15  ;;  %v4188_v15 = vld [vmem:[#allocation11 + $0x40] ss:$8 sps:$4 sm:$0xff]  }
 0x8ff   : > { %2575 = vmatprep.subr.bf16.mxu1 %v4172_v1  ;;  %v4194_v1 = vld [vmem:[#allocation11 + $0x60] ss:$8 sps:$4 sm:$0xff]  }
 0x902   : > { %2576 = vmatpush1.bf16.msra.mxu1 %v4170_v9  ;;  %v4197_v9 = vld [vmem:[#allocation11 + $0x70] ss:$8 sps:$4 sm:$0xff]  }
 0x903   : > { %3071 = vmatprep.subr.bf16.mxu1 %v4178_v48 }
 0x973   : > { %v2032_v56 = vpop.xlane.xlu0 %2031 }
 0x974   : > { %v2043_v60 = vmul.f32 0.00390625, %v2032_v56  ;;  %v4173_v56 = vld [vmem:[#allocation9 + $0x1e8] ss:$16 sps:$4 sm:$0xff]  }
 0x975   : > { %v2035_v57 = vpop.xlane.xlu1 %2034  ;;  %2629 = vmatpush1.bf16.msra.mxu0 %v4173_v56  ;;  %v4202_v56 = vld [vmem:[#allocation11 + $0x84] ss:$8 sps:$4 sm:$0xff]  }
 0x976   : > { %v2044_v61 = vmul.f32 0.00390625, %v2035_v57  ;;  %v5097_v2 = vsub.f32 %v5078_v3, %v2043_v60  ;;  %v5100_v39 = vsub.f32 %v5082_v40, %v2043_v60  ;;  %v4325_v3 = vld [vmem:[%s4852_s25 + $0x28] sm:$0xff]  ;;  %s5381_s25 = sld [smem:[#allocation20_spill]] }
 0x978   : > { %v5108_v53 = vsub.f32 %v5086_v18, %v2044_v61  ;;  %v5111_v50 = vsub.f32 %v5089_v52, %v2044_v61  ;;  %v2055_v18 = vmul.f32 %v5097_v2, %v5097_v2  ;;  %v2056_v52 = vmul.f32 %v5100_v39, %v5100_v39 }
 0x97a   : > { %v2058_v4 = vmul.f32 %v5111_v50, %v5111_v50  ;;  %v2063_v8 = vadd.f32 %v2056_v52, %v2055_v18  ;;  %v2095_v18 = vld [vmem:[%s5344_s9] sm:$0x3] }
 0x97b   : > { %v5159_v52 = vrot.slane %v2095_v18, %v4897_v38 }
 0x9b3   : > { %v2013_v63 = vpop.f32.mrb[28].mxu0 }
 0x9b4   : > { %v2014_v0 = vadd.f32 %v2013_v63, %v5070_v36  ;;  %v2015_v37 = vpop.f32.mrb[29].mxu0 }
 0x9b5   : > { %v2016_v16 = vadd.f32 %v2015_v37, %v5073_v46  ;;  %v2017_v5 = vpop.f32.mrb[30].mxu0 }
 0x9b6   : > { %v5104_v7 = vadd.f32 %v4324_v17, %v2014_v0  ;;  %v2018_v14 = vadd.f32 %v2017_v5, %v5070_v36  ;;  %v2019_v41 = vpop.f32.mrb[31].mxu0 }
 0x9b7   : > { %v5114_v21 = vadd.f32 %v4325_v3, %v2016_v16  ;;  %v2020_v40 = vadd.f32 %v2019_v41, %v5073_v46  ;;  %v2057_v46 = vmul.f32 %v5108_v53, %v5108_v53 }
 0x9b8   : > { %v5118_v30 = vadd.f32 %v4326_v26, %v2018_v14 }
 0x9b9   : > { %v5121_v22 = vadd.f32 %v4327_v32, %v2020_v40  ;;  %v2036_v36 = vadd.f32 %v5114_v21, %v5104_v7  ;;  %v2066_v12 = vadd.f32 %v2058_v4, %v2057_v46  ;;  %v2115_v46 = vld [vmem:[%s5345_s10] sm:$0x3] }
 0x9ba   : > { %v5170_v25 = vrot.slane %v2115_v46, %v4897_v38  ;;  %v5173_v58 = vrot.slane %v2115_v46, %v4905_v44 }
 0x9bb   : > { %2037 = vadd.xlane.f32.xlu0 %v2036_v36  ;;  %v2039_v23 = vadd.f32 %v5121_v22, %v5118_v30 }
 0x9bd   : > { %2040 = vadd.xlane.f32.xlu1 %v2039_v23  ;;  %v5162_v23 = vrot.slane %v2095_v18, %v4905_v44 }
 0x9bf   : > { %2064 = vadd.xlane.f32.xlu0 %v2063_v8 }
 0x9c1   : > { %2067 = vadd.xlane.f32.xlu1 %v2066_v12 }
 0xa48   : > { %v2038_v57 = vpop.xlane.xlu0 %2037 }
 0xa49   : > { %v2045_v60 = vmul.f32 0.00390625, %v2038_v57  ;;  %v4200_v57 = vld [vmem:[#allocation11 + $0x80] ss:$8 sps:$4 sm:$0xff]  }
 0xa4a   : > { %v2041_v61 = vpop.xlane.xlu1 %2040 }
 0xa4b   : > { %v5136_v63 = vsub.f32 %v5104_v7, %v2045_v60  ;;  %v5139_v0 = vsub.f32 %v5114_v21, %v2045_v60  ;;  %v2046_v37 = vmul.f32 0.00390625, %v2041_v61  ;;  %v4205_v60 = vld [vmem:[#allocation11 + $0x94] ss:$8 sps:$4 sm:$0xff]   ;;  %v4203_v61 = vld [vmem:[#allocation11 + $0x90] ss:$8 sps:$4 sm:$0xff]  }
 0xa4c   : > { %v2065_v16 = vpop.xlane.xlu0 %2064 }
 0xa4d   : > { %v5142_v5 = vsub.f32 %v5118_v30, %v2046_v37  ;;  %v5145_v17 = vsub.f32 %v5121_v22, %v2046_v37  ;;  %v2075_v14 = vmul.f32 0.00390625, %v2065_v16  ;;  %v2059_v41 = vmul.f32 %v5136_v63, %v5136_v63  ;;  %v4208_v37 = vld [vmem:[#allocation11 + $0xa4] ss:$8 sps:$4 sm:$0xff]   ;;  %v4206_v16 = vld [vmem:[#allocation11 + $0xa0] ss:$8 sps:$4 sm:$0xff]  }
 0xa4e   : > { %v2068_v3 = vpop.xlane.xlu1 %2067  ;;  %v2060_v7 = vmul.f32 %v5139_v0, %v5139_v0 }
 0xa4f   : > { %v2079_v40 = vadd.f32 1e-05, %v2075_v14  ;;  %v2076_v26 = vmul.f32 0.00390625, %v2068_v3  ;;  %v2061_v21 = vmul.f32 %v5142_v5, %v5142_v5  ;;  %v2062_v30 = vmul.f32 %v5145_v17, %v5145_v17  ;;  %v4211_v14 = vld [vmem:[#allocation11 + $0xb4] ss:$8 sps:$4 sm:$0xff]  }
 0xa50   : > { %v2069_v32 = vadd.f32 %v2060_v7, %v2059_v41  ;;  %v4209_v41 = vld [vmem:[#allocation11 + $0xb0] ss:$8 sps:$4 sm:$0xff]   ;;  %v4214_v3 = vld [vmem:[#allocation11 + $0xc4] ss:$8 sps:$4 sm:$0xff]   ;;  %v4212_v7 = vld [vmem:[#allocation11 + $0xc0] ss:$8 sps:$4 sm:$0xff]  }
 0xa51   : > { %4304 = vrsqrt.f32 %v2079_v40  ;;  %v2080_v22 = vadd.f32 1e-05, %v2076_v26  ;;  %v2072_v36 = vadd.f32 %v2062_v30, %v2061_v21  ;;  %v4217_v40 = vld [vmem:[#allocation11 + $0xd4] ss:$8 sps:$4 sm:$0xff]   ;;  %v4215_v26 = vld [vmem:[#allocation11 + $0xd0] ss:$8 sps:$4 sm:$0xff]  }
 0xa52   : > { %2070 = vadd.xlane.f32.xlu0 %v2069_v32  ;;  %v4220_v21 = vld [vmem:[#allocation11 + $0xe4] ss:$8 sps:$4 sm:$0xff]   ;;  %v4218_v30 = vld [vmem:[#allocation11 + $0xe0] ss:$8 sps:$4 sm:$0xff]   ;;  %v4223_v32 = vld [vmem:[#allocation11 + $0xf4] ss:$8 sps:$4 sm:$0xff]  }
 0xa53   : > { %4306 = vrsqrt.f32 %v2080_v22  ;;  %2073 = vadd.xlane.f32.xlu1 %v2072_v36  ;;  %v4221_v22 = vld [vmem:[#allocation11 + $0xf0] ss:$8 sps:$4 sm:$0xff]   ;;  %v4226_v36 = vld [vmem:[#allocation11 + $0x104] ss:$8 sps:$4 sm:$0xff]  }
 0xa5b   : > { %v4305_v4 = vpop.eup %4304 }
 0xa5c   : > { %v2087_v8 = vmul.f32 %v4305_v4, %v5097_v2  ;;  %v2088_v12 = vmul.f32 %v4305_v4, %v5100_v39 }
 0xa5d   : > { %v4307_v10 = vpop.eup %4306 }
 0xa5e   : > { %v2089_v59 = vmul.f32 %v4307_v10, %v5108_v53  ;;  %v2090_v62 = vmul.f32 %v4307_v10, %v5111_v50  ;;  %v2108_v27 = vmul.f32 %v5162_v23, %v2088_v12  ;;  %v2107_v29 = vmul.f32 %v5159_v52, %v2087_v8 }
 0xa60   : > { %v2110_v33 = vmul.f32 %v5162_v23, %v2090_v62  ;;  %v2109_v2 = vmul.f32 %v5159_v52, %v2089_v59  ;;  %v5182_v39 = vadd.f32 %v5173_v58, %v2108_v27  ;;  %v5188_v42 = vadd.f32 %v5170_v25, %v2107_v29 }
 0xa62   : > { %v5185_v34 = vadd.f32 %v5173_v58, %v2110_v33  ;;  %v5191_v53 = vadd.f32 %v5170_v25, %v2109_v2 }
 0xa64   : > { %v2136_v50 = vpack.c.bf16 %v5185_v34, %v5182_v39  ;;  %v2135_v45 = vpack.c.bf16 %v5191_v53, %v5188_v42 }
 0xa66   : > { %2577 = vmatprep.mubr.bf16.mxu1 %v2136_v50  ;;  %2630 = vmatprep.mubr.bf16.mxu0 %v2136_v50 }
 0xa67   : > { %2578 = vmatmul.mubr.bf16.vlgmr.msra.gmra.mrb[32].mxu1 %v2135_v45  ;;  %2631 = vmatmul.mubr.bf16.vlgmr.msra.gmra.mrb[32].mxu0 %v2135_v45 }
 0xa68   : > { %3072 = vmatpush1.bf16.msra.mxu1 %v4176_v47 }
 0xa69   : > { %3073 = vmatprep.subr.bf16.mxu1 %v4181_v24 }
 0xa6c   : > { %3074 = vmatpush1.bf16.msra.mxu1 %v4179_v28 }
 0xa6d   : > { %3075 = vmatprep.subr.bf16.mxu1 %v4184_v43 }
 0xa70   : > { %3076 = vmatpush1.bf16.msra.mxu1 %v4182_v31 }
 0xa71   : > { %3077 = vmatprep.subr.bf16.mxu1 %v4187_v49 }
 0xa74   : > { %3078 = vmatpush1.bf16.msra.mxu1 %v4185_v19 }
 0xa75   : > { %3079 = vmatprep.subr.bf16.mxu1 %v4190_v20 }
 0xa78   : > { %3080 = vmatpush1.bf16.msra.mxu1 %v4188_v15 }
 0xa79   : > { %3081 = vmatprep.subr.bf16.mxu1 %v4193_v51 }
 0xa7c   : > { %3082 = vmatpush1.bf16.msra.mxu1 %v4191_v54 }
 0xa7d   : > { %3083 = vmatprep.subr.bf16.mxu1 %v4196_v55 }
 0xa80   : > { %3084 = vmatpush1.bf16.msra.mxu1 %v4194_v1 }
 0xa81   : > { %3085 = vmatprep.subr.bf16.mxu1 %v4199_v6 }
 0xa84   : > { %3086 = vmatpush1.bf16.msra.mxu1 %v4197_v9 }
 0xa85   : > { %3087 = vmatprep.subr.bf16.mxu1 %v4202_v56 }
 0xa88   : > { %3088 = vmatpush1.bf16.msra.mxu1 %v4200_v57 }
 0xa89   : > { %3089 = vmatprep.subr.bf16.mxu1 %v4205_v60 }
 0xa8c   : > { %3090 = vmatpush1.bf16.msra.mxu1 %v4203_v61 }
 0xa8d   : > { %3091 = vmatprep.subr.bf16.mxu1 %v4208_v37 }
 0xa90   : > { %3092 = vmatpush1.bf16.msra.mxu1 %v4206_v16 }
 0xa91   : > { %3093 = vmatprep.subr.bf16.mxu1 %v4211_v14 }
 0xa94   : > { %3094 = vmatpush1.bf16.msra.mxu1 %v4209_v41 }
 0xa95   : > { %3095 = vmatprep.subr.bf16.mxu1 %v4214_v3 }
 0xa98   : > { %3096 = vmatpush1.bf16.msra.mxu1 %v4212_v7 }
 0xa99   : > { %3097 = vmatprep.subr.bf16.mxu1 %v4217_v40 }
 0xa9c   : > { %3098 = vmatpush1.bf16.msra.mxu1 %v4215_v26 }
 0xa9d   : > { %3099 = vmatprep.subr.bf16.mxu1 %v4220_v21 }
 0xaa0   : > { %3100 = vmatpush1.bf16.msra.mxu1 %v4218_v30 }
 0xaa1   : > { %3101 = vmatprep.subr.bf16.mxu1 %v4223_v32  ;;  %v4224_v32 = vld [vmem:[#allocation11 + $0x100] ss:$8 sps:$4 sm:$0xff]  }
 0xaa4   : > { %3102 = vmatpush1.bf16.msra.mxu1 %v4221_v22  ;;  %v4229_v22 = vld [vmem:[#allocation11 + $0x114] ss:$8 sps:$4 sm:$0xff]  }
 0xaa5   : > { %3124 = vmatprep.subr.bf16.mxu1 %v4226_v36  ;;  %v4227_v36 = vld [vmem:[#allocation11 + $0x110] ss:$8 sps:$4 sm:$0xff]  }
 0xadf   : > { %v2071_v18 = vpop.xlane.xlu0 %2070 }
 0xae0   : > { %v2077_v46 = vmul.f32 0.00390625, %v2071_v18  ;;  %v2074_v4 = vpop.xlane.xlu1 %2073  ;;  %v4232_v18 = vld [vmem:[#allocation11 + $0x124] ss:$8 sps:$4 sm:$0xff]  }
 0xae1   : > { %v2078_v8 = vmul.f32 0.00390625, %v2074_v4  ;;  %v4235_v4 = vld [vmem:[#allocation11 + $0x134] ss:$8 sps:$4 sm:$0xff]  }
 0xae2   : > { %v2081_v12 = vadd.f32 1e-05, %v2077_v46  ;;  %v4230_v46 = vld [vmem:[#allocation11 + $0x120] ss:$8 sps:$4 sm:$0xff]  }
 0xae3   : > { %v2082_v10 = vadd.f32 1e-05, %v2078_v8  ;;  %v4233_v8 = vld [vmem:[#allocation11 + $0x130] ss:$8 sps:$4 sm:$0xff]  }
 0xae4   : > { %4308 = vrsqrt.f32 %v2081_v12  ;;  %v4238_v12 = vld [vmem:[#allocation11 + $0x144] ss:$8 sps:$4 sm:$0xff]  }
 0xae5   : > { %4310 = vrsqrt.f32 %v2082_v10  ;;  %v4236_v10 = vld [vmem:[#allocation11 + $0x140] ss:$8 sps:$4 sm:$0xff]  }
 0xaee   : > { %v4309_v59 = vpop.eup %4308 }
 0xaef   : > { %v4311_v62 = vpop.eup %4310  ;;  %v2092_v27 = vmul.f32 %v4309_v59, %v5139_v0  ;;  %v2091_v29 = vmul.f32 %v4309_v59, %v5136_v63  ;;  %v4241_v59 = vld [vmem:[#allocation11 + $0x154] ss:$8 sps:$4 sm:$0xff]  }
 0xaf0   : > { %v2094_v33 = vmul.f32 %v4311_v62, %v5145_v17  ;;  %v2093_v2 = vmul.f32 %v4311_v62, %v5142_v5  ;;  %v4239_v62 = vld [vmem:[#allocation11 + $0x150] ss:$8 sps:$4 sm:$0xff]  }
 0xaf1   : > { %v2112_v50 = vmul.f32 %v5162_v23, %v2092_v27  ;;  %v2111_v45 = vmul.f32 %v5159_v52, %v2091_v29  ;;  %v4244_v27 = vld [vmem:[#allocation11 + $0x164] ss:$8 sps:$4 sm:$0xff]   ;;  %v4242_v29 = vld [vmem:[#allocation11 + $0x160] ss:$8 sps:$4 sm:$0xff]  }
 0xaf2   : > { %v2114_v47 = vmul.f32 %v5162_v23, %v2094_v33  ;;  %v2113_v48 = vmul.f32 %v5159_v52, %v2093_v2  ;;  %v2203_v52 = vld [vmem:[%s5341_s6] sm:$0xf]  ;;  %v4247_v33 = vld [vmem:[#allocation11 + $0x174] ss:$8 sps:$4 sm:$0xff]   ;;  %v4245_v2 = vld [vmem:[#allocation11 + $0x170] ss:$8 sps:$4 sm:$0xff]  }
 0xaf3   : > { %v5206_v24 = vadd.f32 %v5173_v58, %v2112_v50  ;;  %v5212_v63 = vadd.f32 %v5170_v25, %v2111_v45  ;;  %v5225_v23 = vrot.slane %v2203_v52, %v4897_v38  ;;  %v5236_v43 = vrot.slane %v2203_v52, %v645_v13  ;;  %v4250_v50 = vld [vmem:[#allocation11 + $0x184] ss:$8 sps:$4 sm:$0xff]   ;;  %v4248_v45 = vld [vmem:[#allocation11 + $0x180] ss:$8 sps:$4 sm:$0xff]  }
 0xaf4   : > { %v5209_v28 = vadd.f32 %v5173_v58, %v2114_v47  ;;  %v5215_v0 = vadd.f32 %v5170_v25, %v2113_v48  ;;  %v5229_v25 = vrot.slane %v2203_v52, %v641_v11  ;;  %v5232_v58 = vrot.slane %v2203_v52, %v4905_v44  ;;  %v4253_v47 = vld [vmem:[#allocation11 + $0x194] ss:$8 sps:$4 sm:$0xff]   ;;  %v4251_v48 = vld [vmem:[#allocation11 + $0x190] ss:$8 sps:$4 sm:$0xff]  }
 0xaf5   : > { %v4259_v52 = vld [vmem:[#allocation11 + $0x1b4] ss:$8 sps:$4 sm:$0xff]  }
 0xaf6   : > { %v2138_v5 = vpack.c.bf16 %v5209_v28, %v5206_v24  ;;  %v2137_v17 = vpack.c.bf16 %v5215_v0, %v5212_v63 }
 0xaf8   : > { %2587 = vmatprep.mubr.bf16.mxu1 %v2138_v5  ;;  %2640 = vmatprep.mubr.bf16.mxu0 %v2138_v5  ;;  %v4256_v5 = vld [vmem:[#allocation11 + $0x1a4] ss:$8 sps:$4 sm:$0xff]  }
 0xaf9   : > { %2588 = vmatmul.mubr.bf16.gmra.mrb[36].mxu1 %v2137_v17  ;;  %2641 = vmatmul.mubr.bf16.gmra.mrb[36].mxu0 %v2137_v17  ;;  %v4254_v17 = vld [vmem:[#allocation11 + $0x1a0] ss:$8 sps:$4 sm:$0xff]  }
 0xb3a   : > { %v2579_v31 = vpop.f32.mrb[32].mxu1  ;;  %v2632_v49 = vpop.f32.mrb[32].mxu0 }
 0xb3b   : > { %v2580_v19 = vadd.f32 %v2579_v31, %v5225_v23  ;;  %v2633_v20 = vadd.f32 %v2632_v49, %v5229_v25  ;;  %v2581_v15 = vpop.f32.mrb[33].mxu1  ;;  %v2634_v51 = vpop.f32.mrb[33].mxu0  ;;  %v4257_v31 = vld [vmem:[#allocation11 + $0x1b0] ss:$8 sps:$4 sm:$0xff]   ;;  %v4262_v49 = vld [vmem:[#allocation11 + $0x1c4] ss:$8 sps:$4 sm:$0xff]  }
 0xb3c   : > { %v2582_v54 = vadd.f32 %v2581_v15, %v5232_v58  ;;  %v2635_v11 = vadd.f32 %v2634_v51, %v5236_v43  ;;  %v2583_v55 = vpop.f32.mrb[34].mxu1  ;;  %v2636_v1 = vpop.f32.mrb[34].mxu0  ;;  %v4263_v15 = vld [vmem:[#allocation11 + $0x1d0] ss:$8 sps:$4 sm:$0xff]   ;;  %v4268_v51 = vld [vmem:[#allocation11 + $0x1e4] ss:$8 sps:$4 sm:$0xff]  }
 0xb3d   : > { %v2584_v6 = vadd.f32 %v2583_v55, %v5225_v23  ;;  %v2637_v35 = vadd.f32 %v2636_v1, %v5229_v25  ;;  %v2585_v13 = vpop.f32.mrb[35].mxu1  ;;  %v2638_v9 = vpop.f32.mrb[35].mxu0  ;;  %v2651_v60 = vmax.f32 %v2580_v19, 0.0  ;;  %v2653_v61 = vmax.f32 %v2633_v20, 0.0  ;;  %v4260_v19 = vld [vmem:[#allocation11 + $0x1c0] ss:$8 sps:$4 sm:$0xff]  }
 0xb3e   : > { %v2586_v56 = vadd.f32 %v2585_v13, %v5232_v58  ;;  %v2639_v57 = vadd.f32 %v2638_v9, %v5236_v43  ;;  %v2652_v14 = vmax.f32 %v2582_v54, 0.0  ;;  %v2654_v41 = vmax.f32 %v2635_v11, 0.0  ;;  %v4265_v20 = vld [vmem:[#allocation11 + $0x1d4] ss:$8 sps:$4 sm:$0xff]   ;;  %v4266_v54 = vld [vmem:[#allocation11 + $0x1e0] ss:$8 sps:$4 sm:$0xff]  }
 0xb3f   : > { %v2655_v37 = vmax.f32 %v2584_v6, 0.0  ;;  %v2657_v16 = vmax.f32 %v2637_v35, 0.0  ;;  %v4271_v11 = vld [vmem:[#allocation11 + $0x1f4] ss:$8 sps:$4 sm:$0xff]   ;;  %v4269_v55 = vld [vmem:[#allocation11 + $0x1f0] ss:$8 sps:$4 sm:$0xff]  }
 0xb40   : > { %v2656_v3 = vmax.f32 %v2586_v56, 0.0  ;;  %v2658_v7 = vmax.f32 %v2639_v57, 0.0 }
 0xb41   : > { %v2667_v40 = vpack.c.bf16 %v2655_v37, %v2651_v60  ;;  %v5246_v26 = vpack.c.bf16 %v2657_v16, %v2653_v61 }
 0xb42   : > { %v2668_v21 = vpack.c.bf16 %v2656_v3, %v2652_v14  ;;  %v5248_v30 = vpack.c.bf16 %v2658_v7, %v2654_v41 }
 0xb44   : > { %3103 = vmatprep.mubr.bf16.mxu1 %v2668_v21 }
 0xb45   : > { %3104 = vmatmul.mubr.bf16.vlgmr.msra.gmra.mrb[40].mxu1 %v2667_v40 }
 0xb46   : > { %3125 = vmatpush1.bf16.msra.mxu1 %v4224_v32 }
 0xb47   : > { %3126 = vmatprep.subr.bf16.mxu1 %v4229_v22 }
 0xb4a   : > { %3127 = vmatpush1.bf16.msra.mxu1 %v4227_v36 }
 0xb4b   : > { %3128 = vmatprep.subr.bf16.mxu1 %v4232_v18 }
 0xb4e   : > { %3129 = vmatpush1.bf16.msra.mxu1 %v4230_v46 }
 0xb4f   : > { %3130 = vmatprep.subr.bf16.mxu1 %v4235_v4 }
 0xb52   : > { %3131 = vmatpush1.bf16.msra.mxu1 %v4233_v8 }
 0xb53   : > { %3132 = vmatprep.subr.bf16.mxu1 %v4238_v12 }
 0xb56   : > { %3133 = vmatpush1.bf16.msra.mxu1 %v4236_v10 }
 0xb57   : > { %3134 = vmatprep.subr.bf16.mxu1 %v4241_v59 }
 0xb5a   : > { %3135 = vmatpush1.bf16.msra.mxu1 %v4239_v62 }
 0xb5b   : > { %3136 = vmatprep.subr.bf16.mxu1 %v4244_v27 }
 0xb5e   : > { %3137 = vmatpush1.bf16.msra.mxu1 %v4242_v29 }
 0xb5f   : > { %3138 = vmatprep.subr.bf16.mxu1 %v4247_v33 }
 0xb62   : > { %3139 = vmatpush1.bf16.msra.mxu1 %v4245_v2 }
 0xb63   : > { %3140 = vmatprep.subr.bf16.mxu1 %v4250_v50 }
 0xb66   : > { %3141 = vmatpush1.bf16.msra.mxu1 %v4248_v45 }
 0xb67   : > { %3142 = vmatprep.subr.bf16.mxu1 %v4253_v47 }
 0xb6a   : > { %3143 = vmatpush1.bf16.msra.mxu1 %v4251_v48 }
 0xb6b   : > { %3144 = vmatprep.subr.bf16.mxu1 %v4256_v5 }
 0xb6e   : > { %3145 = vmatpush1.bf16.msra.mxu1 %v4254_v17 }
 0xb6f   : > { %3146 = vmatprep.subr.bf16.mxu1 %v4259_v52 }
 0xb72   : > { %3147 = vmatpush1.bf16.msra.mxu1 %v4257_v31 }
 0xb73   : > { %3148 = vmatprep.subr.bf16.mxu1 %v4262_v49 }
 0xb76   : > { %3149 = vmatpush1.bf16.msra.mxu1 %v4260_v19 }
 0xb77   : > { %3150 = vmatprep.subr.bf16.mxu1 %v4265_v20 }
 0xb7a   : > { %3151 = vmatpush1.bf16.msra.mxu1 %v4263_v15 }
 0xb7b   : > { %3152 = vmatprep.subr.bf16.mxu1 %v4268_v51 }
 0xb7e   : > { %3153 = vmatpush1.bf16.msra.mxu1 %v4266_v54 }
 0xb7f   : > { %3154 = vmatprep.subr.bf16.mxu1 %v4271_v11 }
 0xb82   : > { %3155 = vmatpush1.bf16.msra.mxu1 %v4269_v55 }
 0xbcc   : > { %v2589_v1 = vpop.f32.mrb[36].mxu1  ;;  %v2642_v6 = vpop.f32.mrb[36].mxu0 }
 0xbcd   : > { %v2590_v35 = vadd.f32 %v2589_v1, %v5225_v23  ;;  %v2643_v13 = vadd.f32 %v2642_v6, %v5229_v25  ;;  %v2591_v9 = vpop.f32.mrb[37].mxu1  ;;  %v2644_v56 = vpop.f32.mrb[37].mxu0 }
 0xbce   : > { %v2592_v57 = vadd.f32 %v2591_v9, %v5232_v58  ;;  %v2645_v60 = vadd.f32 %v2644_v56, %v5236_v43  ;;  %v2593_v61 = vpop.f32.mrb[38].mxu1  ;;  %v2646_v37 = vpop.f32.mrb[38].mxu0 }
 0xbcf   : > { %v2594_v16 = vadd.f32 %v2593_v61, %v5225_v23  ;;  %v2647_v14 = vadd.f32 %v2646_v37, %v5229_v25  ;;  %v2595_v41 = vpop.f32.mrb[39].mxu1  ;;  %v2648_v3 = vpop.f32.mrb[39].mxu0  ;;  %v2659_v21 = vmax.f32 %v2590_v35, 0.0  ;;  %v2661_v32 = vmax.f32 %v2643_v13, 0.0  ;;  %v2739_v25 = vld [vmem:[%s5381_s25] sm:$0x3] }
 0xbd0   : > { %v2596_v7 = vadd.f32 %v2595_v41, %v5232_v58  ;;  %v2649_v40 = vadd.f32 %v2648_v3, %v5236_v43  ;;  %v2660_v18 = vmax.f32 %v2592_v57, 0.0  ;;  %v2662_v46 = vmax.f32 %v2645_v60, 0.0  ;;  %s4470_s25 = scalar_lea.vmem %s5291_s11, 1024 }
 0xbd1   : > { %v2663_v22 = vmax.f32 %v2594_v16, 0.0  ;;  %v2665_v36 = vmax.f32 %v2647_v14, 0.0  ;;  %v2744_v58 = vrot.slane %v2739_v25, %v4897_v38  ;;  %v2748_v43 = vrot.slane %v2739_v25, %v4905_v44  ;;  %p4471_p3 = scmp.ne.s32.totalorder %s5291_s11, %s4470_s25 }
 0xbd2   : > { %v2664_v4 = vmax.f32 %v2596_v7, 0.0  ;;  %v2666_v8 = vmax.f32 %v2649_v40, 0.0 }
 0xbd3   : > { %v2671_v12 = vpack.c.bf16 %v2663_v22, %v2659_v21  ;;  %v2673_v10 = vpack.c.bf16 %v2665_v36, %v2661_v32  ;;  %p4472_p5 = pnand %p4471_p3, %p4791_p10 }
 0xbd4   : > { %v2672_v59 = vpack.c.bf16 %v2664_v4, %v2660_v18  ;;  %v2674_v23 = vpack.c.bf16 %v2666_v8, %v2662_v46 }
 0xbd5   : > { %p4473_p7 = pneg %p4472_p5 }
 0xbd6   : > { %3113 = vmatprep.mubr.bf16.mxu1 %v2672_v59 }
 0xbd7   : > { %3114 = vmatmul.mubr.bf16.gmra.mrb[44].mxu1 %v2671_v12 }
 0xbd8   : > { %3156 = vmatprep.mubr.bf16.mxu1 %v5248_v30 }
 0xbdf   : > { %3157 = vmatmul.mubr.bf16.vlgmr.msra.gmra.mrb[40].mxu1 %v5246_v26 }
 0xbe0   : > { %3166 = vmatprep.mubr.bf16.mxu1 %v2674_v23 }
 0xbe7   : > { %3167 = vmatmul.mubr.bf16.gmra.mrb[44].mxu1 %v2673_v10 }
 0xcb2   : > { %v3158_v62 = vpop.f32.mrb[40].mxu1 }
 0xcb3   : > { %v3775_v27 = vadd.f32 %v3158_v62, %v2744_v58  ;;  %v3160_v29 = vpop.f32.mrb[41].mxu1 }
 0xcb4   : > { %v3776_v33 = vadd.f32 %v3160_v29, %v2748_v43  ;;  %v3162_v2 = vpop.f32.mrb[42].mxu1 }
 0xcb5   : > { %v3177_v50 = vadd.f32 %v3775_v27, %v5188_v42  ;;  %v3777_v30 = vadd.f32 %v3162_v2, %v2744_v58  ;;  %v3164_v45 = vpop.f32.mrb[43].mxu1 }
 0xcb6   : > { %v3178_v26 = vadd.f32 %v3776_v33, %v5182_v39  ;;  %v3778_v47 = vadd.f32 %v3164_v45, %v2748_v43  ;;  %v3249_v33 = vld [vmem:[%s5382_s22] sm:$0x3]  ;;  %s4476_s22 = scalar_lea.vmem %s4475_s16, 2048 }
 0xcb7   : > { %v3179_v48 = vadd.f32 %v3777_v30, %v5191_v53  ;;  %v3269_v30 = vld [vmem:[%s5383_s17] sm:$0x3]  ;;  %p4478_p2 = scmp.lt.s32.totalorder %s4476_s22, %s4470_s25 }
 0xcb8   : > { %v3180_v5 = vadd.f32 %v3778_v47, %v5185_v34  ;;  %v3185_v17 = vadd.f32 %v3178_v26, %v3177_v50  ;;  %v3258_v47 = vrot.slane %v3249_v33, %v4905_v44 }
 0xcb9   : > { %p4479_p1 = por %p4478_p2, %p4477_p12 }
 0xcba   : > { %v3168_v52 = vpop.f32.mrb[44].mxu1  ;;  %3186 = vadd.xlane.f32.xlu0 %v3185_v17  ;;  %v3188_v31 = vadd.f32 %v3180_v5, %v3179_v48  ;;  %v3278_v17 = vrot.slane %v3269_v30, %v4905_v44 }
 0xcbb   : > { %v3779_v49 = vadd.f32 %v3168_v52, %v2744_v58  ;;  %v3170_v19 = vpop.f32.mrb[45].mxu1  ;;  %p4480_p13 = pnand %p4479_p1, %p4473_p7 }
 0xcbc   : > { %v3780_v20 = vadd.f32 %v3170_v19, %v2748_v43  ;;  %v3172_v15 = vpop.f32.mrb[46].mxu1  ;;  %3189 = vadd.xlane.f32.xlu1 %v3188_v31 }
 0xcbd   : > { %v3181_v42 = vadd.f32 %v3779_v49, %v5212_v63  ;;  %v3781_v51 = vadd.f32 %v3172_v15, %v2744_v58  ;;  %v3174_v54 = vpop.f32.mrb[47].mxu1 }
 0xcbe   : > { %v3182_v39 = vadd.f32 %v3780_v20, %v5206_v24  ;;  %v3782_v11 = vadd.f32 %v3174_v54, %v2748_v43 }
 0xcbf   : > { %v3183_v53 = vadd.f32 %v3781_v51, %v5215_v0 }
 0xcc0   : > { %v3184_v34 = vadd.f32 %v3782_v11, %v5209_v28  ;;  %v3191_v55 = vadd.f32 %v3182_v39, %v3181_v42 }
 0xcc2   : > { %3192 = vadd.xlane.f32.xlu0 %v3191_v55  ;;  %v3194_v1 = vadd.f32 %v3184_v34, %v3183_v53 }
 0xcc4   : > { %3195 = vadd.xlane.f32.xlu1 %v3194_v1 }
 0xd47   : > { %v3187_v6 = vpop.xlane.xlu0 %3186 }
 0xd48   : > { %v3197_v35 = vmul.f32 0.00390625, %v3187_v6 }
 0xd49   : > { %v3190_v13 = vpop.xlane.xlu1 %3189 }
 0xd4a   : > { %v3201_v9 = vsub.f32 %v3177_v50, %v3197_v35  ;;  %v3202_v56 = vsub.f32 %v3178_v26, %v3197_v35  ;;  %v3198_v57 = vmul.f32 0.00390625, %v3190_v13  ;;  %v3254_v26 = vrot.slane %v3249_v33, %v4897_v38 }
 0xd4c   : > { %v3203_v63 = vsub.f32 %v3179_v48, %v3198_v57  ;;  %v3204_v60 = vsub.f32 %v3180_v5, %v3198_v57  ;;  %v3209_v61 = vmul.f32 %v3201_v9, %v3201_v9  ;;  %v3210_v37 = vmul.f32 %v3202_v56, %v3202_v56 }
 0xd4d   : > { %v3274_v5 = vrot.slane %v3269_v30, %v4897_v38 }
 0xd4e   : > { %v3217_v24 = vadd.f32 %v3210_v37, %v3209_v61  ;;  %v3211_v16 = vmul.f32 %v3203_v63, %v3203_v63  ;;  %v3212_v14 = vmul.f32 %v3204_v60, %v3204_v60 }
 0xd4f   : > { %v3193_v0 = vpop.xlane.xlu0 %3192 }
 0xd50   : > { %v3199_v41 = vmul.f32 0.00390625, %v3193_v0  ;;  %3218 = vadd.xlane.f32.xlu0 %v3217_v24  ;;  %v3220_v28 = vadd.f32 %v3212_v14, %v3211_v16 }
 0xd51   : > { %v3196_v3 = vpop.xlane.xlu1 %3195 }
 0xd52   : > { %v3205_v7 = vsub.f32 %v3181_v42, %v3199_v41  ;;  %v3206_v40 = vsub.f32 %v3182_v39, %v3199_v41  ;;  %v3200_v21 = vmul.f32 0.00390625, %v3196_v3  ;;  %3221 = vadd.xlane.f32.xlu1 %v3220_v28 }
 0xd54   : > { %v3207_v32 = vsub.f32 %v3183_v53, %v3200_v21  ;;  %v3208_v22 = vsub.f32 %v3184_v34, %v3200_v21  ;;  %v3213_v36 = vmul.f32 %v3205_v7, %v3205_v7  ;;  %v3214_v18 = vmul.f32 %v3206_v40, %v3206_v40 }
 0xd56   : > { %v3223_v46 = vadd.f32 %v3214_v18, %v3213_v36  ;;  %v3215_v4 = vmul.f32 %v3207_v32, %v3207_v32  ;;  %v3216_v8 = vmul.f32 %v3208_v22, %v3208_v22 }
 0xd58   : > { %3224 = vadd.xlane.f32.xlu0 %v3223_v46  ;;  %v3226_v12 = vadd.f32 %v3216_v8, %v3215_v4 }
 0xd5a   : > { %3227 = vadd.xlane.f32.xlu1 %v3226_v12 }
 0xddd   : > { %v3219_v10 = vpop.xlane.xlu0 %3218 }
 0xdde   : > { %v3229_v59 = vmul.f32 0.00390625, %v3219_v10 }
 0xddf   : > { %v3222_v23 = vpop.xlane.xlu1 %3221 }
 0xde0   : > { %v3233_v25 = vadd.f32 1e-05, %v3229_v59  ;;  %v3230_v58 = vmul.f32 0.00390625, %v3222_v23 }
 0xde2   : > { %4312 = vrsqrt.f32 %v3233_v25  ;;  %v3234_v43 = vadd.f32 1e-05, %v3230_v58 }
 0xde4   : > { %4314 = vrsqrt.f32 %v3234_v43 }
 0xde5   : > { %v3225_v62 = vpop.xlane.xlu0 %3224 }
 0xde6   : > { %v3231_v27 = vmul.f32 0.00390625, %v3225_v62 }
 0xde7   : > { %v3228_v29 = vpop.xlane.xlu1 %3227 }
 0xde8   : > { %v3235_v2 = vadd.f32 1e-05, %v3231_v27  ;;  %v3232_v50 = vmul.f32 0.00390625, %v3228_v29 }
 0xdea   : > { %4316 = vrsqrt.f32 %v3235_v2  ;;  %v3236_v45 = vadd.f32 1e-05, %v3232_v50 }
 0xdec   : > { %v4313_v48 = vpop.eup %4312  ;;  %4318 = vrsqrt.f32 %v3236_v45 }
 0xded   : > { %v3241_v52 = vmul.f32 %v4313_v48, %v3201_v9  ;;  %v3242_v31 = vmul.f32 %v4313_v48, %v3202_v56 }
 0xdee   : > { %v4315_v49 = vpop.eup %4314 }
 0xdef   : > { %v3261_v19 = vmul.f32 %v3254_v26, %v3241_v52  ;;  %v3262_v20 = vmul.f32 %v3258_v47, %v3242_v31  ;;  %v3243_v15 = vmul.f32 %v4315_v49, %v3203_v63  ;;  %v3244_v42 = vmul.f32 %v4315_v49, %v3204_v60 }
 0xdf1   : > { %v3281_v51 = vadd.f32 %v3274_v5, %v3261_v19  ;;  %v3282_v54 = vadd.f32 %v3278_v17, %v3262_v20  ;;  %v3263_v39 = vmul.f32 %v3254_v26, %v3243_v15  ;;  %v3264_v11 = vmul.f32 %v3258_v47, %v3244_v42 }
 0xdf3   : > { %3289 = vst [vmem:[%s517_s30] sm:$0xff] %v3281_v51  ;;  %3290 = vst [vmem:[%s517_s30 + $0x8] sm:$0xff] %v3282_v54  ;;  %v3283_v53 = vadd.f32 %v3274_v5, %v3263_v39  ;;  %v3284_v38 = vadd.f32 %v3278_v17, %v3264_v11 }
 0xdf4   : > { %v4317_v34 = vpop.eup %4316 }
 0xdf5   : > { %3291 = vst [vmem:[%s517_s30 + $0x10] sm:$0xff] %v3283_v53  ;;  %3292 = vst [vmem:[%s517_s30 + $0x18] sm:$0xff] %v3284_v38  ;;  %v3245_v44 = vmul.f32 %v4317_v34, %v3205_v7  ;;  %v3246_v55 = vmul.f32 %v4317_v34, %v3206_v40 }
 0xdf6   : > { %v4319_v1 = vpop.eup %4318 }
 0xdf7   : > { %v3265_v6 = vmul.f32 %v3254_v26, %v3245_v44  ;;  %v3266_v35 = vmul.f32 %v3258_v47, %v3246_v55  ;;  %v3247_v13 = vmul.f32 %v4319_v1, %v3207_v32  ;;  %v3248_v9 = vmul.f32 %v4319_v1, %v3208_v22 }
 0xdf9   : > { %v3285_v56 = vadd.f32 %v3274_v5, %v3265_v6  ;;  %v3286_v57 = vadd.f32 %v3278_v17, %v3266_v35  ;;  %v3267_v63 = vmul.f32 %v3254_v26, %v3247_v13  ;;  %v3268_v60 = vmul.f32 %v3258_v47, %v3248_v9 }
 0xdfb   : > { %3293 = vst [vmem:[%s517_s30 + $0x20] sm:$0xff] %v3285_v56  ;;  %3294 = vst [vmem:[%s517_s30 + $0x28] sm:$0xff] %v3286_v57  ;;  %v3287_v61 = vadd.f32 %v3274_v5, %v3267_v63  ;;  %v3288_v37 = vadd.f32 %v3278_v17, %v3268_v60 }
 0xdfd   : > { %3295 = vst [vmem:[%s517_s30 + $0x30] sm:$0xff] %v3287_v61  ;;  %3296 = vst [vmem:[%s517_s30 + $0x38] sm:$0xff] %v3288_v37 }
 0xdfe   : > { %4483 = shalt.err (!%p4480_p13)
}
 0xdff   : > { %s4484_s21 = scalar_lea.hbm %s5289_s13, 1024  ;;  %s4488_s30 = scalar_lea.hbm %s5384_s19, 2048 }
 0xe00   : > { %p4485_p9 = scmp.ne.s32.totalorder %s5289_s13, %s4484_s21  ;;  %p4489_p4 = scmp.lt.u32.totalorder %s5289_s13, %s5384_s19 }
 0xe01   : > { %p4490_p8 = scmp.lt.u32.totalorder %s4488_s30, %s4484_s21  ;;  %p4492_p3 = scmp.lt.u32.totalorder %s4484_s21, %s5289_s13 }
 0xe02   : > { %p4486_p0 = pnand %p4485_p9, %p4791_p10 }
 0xe03   : > { %p4491_p6 = por %p4490_p8, %p4489_p4 }
 0xe04   : > { %p4487_p11 = pneg %p4486_p0 }
 0xe05   : > { %p4493_p5 = por %p4492_p3, %p4491_p6 }
 0xe07   : > { %p4494_p7 = pnand %p4493_p5, %p4487_p11 }
 0xe09   : > { %4497 = shalt.err (!%p4494_p7)
}
 0xe0a   : > { %s4560_s23 = smov 256   ;;  %s4561_s25 = smov 16  }
 0xe0b   : > { %3809 = dma.vmem_to_hbm [thread:$0]  (%p4791_p10), %s5291_s11, 1024, %s5289_s13, %s3298_s29, %s4560_s23, %s4560_s23, %s4561_s25  }
 0xe0c PF: > { %s5385_s14 = sld [smem:[#allocation17_spill]]  ;;  %s5386_s16 = sld [smem:[#allocation18_spill]] }
 0xe0d   : > { %p5388_p2 = scmp.ge.s32.totalorder %s4544_s28, 2 }
 0xe12   : > { %s3327_s22 = sand.u32 1, %s5385_s14   ;;  %p5387_p12 = scmp.ne.s32.totalorder %s5386_s16, 0 }
 0xe13   : > { %s3328_s21 = scalar_lea.sflag [#allocation5], %s3327_s22 }
 0xe14   : > { %p3829_p1 = pnand %p5388_p2, %p5387_p12 }
 0xe16   : > { %4527 = dma.done.wait (!%p3829_p1), %s3328_s21, 1024  }
 0xe17   : > { %4529 = vsyncadd (!%p3829_p1), %s3328_s21, 4294966272  ;;  %p28_p13 = scmp.ge.s32.totalorder %s4781_s15, 4   ;;  %s5389_s25 = smov %s4536_s26 }
 0xe18   : > { %s5390_s26 = smov %s4540_s27  ;;  %s5391_s27 = smov %s4797_s24 }
 0xe19   : > { %s5392_s28 = smov %s4781_s15  ;;  %30 = sbr.rel (!%p28_p13) target bundleno = 13 (0xd), region = 133 }
 0xe20   :  { %3333 = vsyncpa [#allocation4], 1 }
 0xe21   :  { %3335 = vsyncpa [#allocation4 + $0x1], 1 }
 0xe22   :  { %3336 = vsyncpa [#allocation7], 1 }
 0xe23   :  { %3337 = vsyncpa [#allocation10], 1 }
 0xe24   :  { %3338 = vsyncpa [#allocation5], 1 }
 0xe25   :  { %3340 = vsyncpa [#allocation5 + $0x1], 1 }

</bundles_post_ra>
